<compile_context>
chip_gen: v7x
topology: tpu7x:2x2x1
jax: 0.10.0
libtpu: 0.0.40
codegen_flags: <defaults>
</compile_context>

<pallas_src>
import functools
import math

import jax
import jax.numpy as jnp
from jax.experimental import pallas as pl
from jax.experimental.pallas import tpu as pltpu


# ----------------------------------------------------------------------------
# Fused decoder kernel: one batch element per grid step.
# Layout: channels-first, parity-plane ("sub-pixel") spatial flattening:
#   activations are (C, 4*S) where lane index = t*S + i*w + j,
#   t = ph*2 + pw is the output-pixel parity (row, col), (i, j) is the
#   quarter-resolution base position, S = h*w.
# ----------------------------------------------------------------------------
def _decoder_kernel(x_ref, wup_ref, w1_ref, w2_ref, o_ref, *,
                    h, w, c_out, negative_slope, eps):
    f32, bf16 = jnp.float32, jnp.bfloat16
    s = h * w                                   # quarter-res spatial per plane

    # Lane-position helpers for one quarter-res plane (trace-time constants).
    pos = jax.lax.broadcasted_iota(jnp.int32, (1, s), 1)
    col = pos % w
    valid_up = pos >= w                         # source row i-1 is in range
    valid_down = pos < (h - 1) * w              # source row i+1 is in range
    valid_left = col >= 1                       # source col j-1 is in range
    valid_right = col < (w - 1)                 # source col j+1 is in range

    def shift_plane(src, d):
        """out[:, p] = src[:, p + d] where in range, zeros elsewhere.
        Static lane slice + concat (direction-explicit; lowers to cheap lane
        shifts, same slot as pltpu.roll)."""
        if d == 0:
            return src
        pad = jnp.zeros((src.shape[0], abs(d)), src.dtype)
        if d > 0:
            return jnp.concatenate([src[:, d:], pad], axis=1)
        return jnp.concatenate([pad, src[:, :d]], axis=1)

    def tap_mask(bi, bj):
        m = None
        if bi == -1:
            m = valid_up
        elif bi == 1:
            m = valid_down
        if bj == -1:
            m = valid_left if m is None else jnp.logical_and(m, valid_left)
        elif bj == 1:
            m = valid_right if m is None else jnp.logical_and(m, valid_right)
        return m

    def inorm_lrelu(a):
        """InstanceNorm2d (affine=False, biased var, eps) + LeakyReLU, f32.
        Per-channel stats over all 4*S spatial positions (lane reduction)."""
        n = a.shape[1]
        mu = jnp.sum(a, axis=1, keepdims=True) * (1.0 / n)
        var = jnp.sum(jnp.square(a - mu), axis=1, keepdims=True) * (1.0 / n)
        y = (a - mu) * jax.lax.rsqrt(var + eps)              # rsqrt -> EUP
        return jnp.where(y >= 0, y, negative_slope * y)

    def conv3x3(a, w_cat_ref):
        """3x3 / pad=1 / no-bias conv on the parity-plane rep.
        a: (Cin, 4*S) bf16.  One fused-K matmul: (Cout, 9*Cin) @ (9*Cin, 4*S)."""
        planes = [a[:, t * s:(t + 1) * s] for t in range(4)]     # (Cin, S) x4
        cols = []
        for ph in range(2):
            for pw in range(2):
                taps = []
                for kh in range(3):
                    for kw in range(3):
                        dh, dw = kh - 1, kw - 1
                        qh, bi = (ph + dh) % 2, (ph + dh) // 2   # src parity/shift
                        qw, bj = (pw + dw) % 2, (pw + dw) // 2
                        src = shift_plane(planes[qh * 2 + qw], bi * w + bj)
                        m = tap_mask(bi, bj)
                        if m is not None:
                            src = jnp.where(m, src, jnp.zeros_like(src))
                        taps.append(src)
                cols.append(jnp.concatenate(taps, axis=0))        # (9*Cin, S)
        x_cat = jnp.concatenate(cols, axis=1)                     # (9*Cin, 4*S)
        return jnp.dot(w_cat_ref[...], x_cat, preferred_element_type=f32)

    # ---- up_conv: ConvTranspose2d(k=2, s=2, bias=False) -> ONE matmul -------
    x = x_ref[0]                                                  # (Cin, S) bf16
    up_all = jnp.dot(wup_ref[...], x, preferred_element_type=f32)  # (4*Cout, S)
    # plane groups: sublanes -> lanes (parity-plane rep), plain slices+concat.
    up = jnp.concatenate(
        [up_all[t * c_out:(t + 1) * c_out, :] for t in range(4)], axis=1)

    # ---- up_norm + act, conv1 + norm + act, conv2 + norm + act --------------
    y = inorm_lrelu(up)                                           # (Cout, 4*S) f32
    y = inorm_lrelu(conv3x3(y.astype(bf16), w1_ref))
    # TODO(synk): nn.Dropout2d(0.2) is identity in eval/inference mode; omitted.
    y = inorm_lrelu(conv3x3(y.astype(bf16), w2_ref))

    o_ref[0] = y.astype(o_ref.dtype)                              # lane-dense store


# ----------------------------------------------------------------------------
# Wrapper: weight fusion / layout plumbing (XLA side), pallas_call.
# ----------------------------------------------------------------------------
def transformer_decoder_forward(x, params, *, negative_slope=0.2, eps=1e-5):
    """x: (B, S, D) with S=h*w (module's 3-D path) or (B, C, H, W).
    Returns NCHW (B, D//2, 2h, 2w), matching the PyTorch module (eval mode)."""
    if x.ndim == 4:
        B, Cin, H, W = x.shape
        h, w = H, W
        x_cf = x.reshape(B, Cin, H * W)                 # already channels-first
    else:
        B, S_, Cin = x.shape
        h = w = int(round(math.sqrt(S_)))
        assert h * w == S_, "seq_length must be a perfect square"
        x_cf = jnp.transpose(x, (0, 2, 1))              # (B, Cin, S)
    S = h * w

    up_w = params['up_w']            # (Cin, Cout, 2, 2)  ConvTranspose2d layout
    conv1_w = params['conv1_w']      # (Cout, Cout, 3, 3) Conv2d layout
    conv2_w = params['conv2_w']
    Cout = up_w.shape[1]
    assert 2 * Cout == Cin, "module requires out_channels == in_channels // 2"

    # Fused-K weight matrices (bf16 MXU operands, f32 accumulation in-kernel).
    #   wup_cat[(kh*2+kw)*Cout + co, ci] = up_w[ci, co, kh, kw]
    #   wX_cat [co, (kh*3+kw)*Cin2 + ci] = convX_w[co, ci, kh, kw]
    wup_cat = jnp.transpose(up_w, (2, 3, 1, 0)).reshape(4 * Cout, Cin)
    w1_cat = jnp.transpose(conv1_w, (0, 2, 3, 1)).reshape(Cout, 9 * Cout)
    w2_cat = jnp.transpose(conv2_w, (0, 2, 3, 1)).reshape(Cout, 9 * Cout)
    wup_cat = wup_cat.astype(jnp.bfloat16)
    w1_cat = w1_cat.astype(jnp.bfloat16)
    w2_cat = w2_cat.astype(jnp.bfloat16)
    x16 = x_cf.astype(jnp.bfloat16)

    kernel = functools.partial(_decoder_kernel, h=h, w=w, c_out=Cout,
                               negative_slope=negative_slope, eps=eps)

    # Honest cost estimate (no zero-matmul FLOPs, bf16 input bytes).
    flops_per_b = (2 * (4 * Cout) * Cin * S                     # up_conv matmul
                   + 2 * (2 * Cout * (9 * Cout) * (4 * S))      # two 3x3 convs
                   + 3 * 10 * Cout * 4 * S)                     # norms / lrelu
    cost = pl.CostEstimate(
        flops=int(B * flops_per_b),
        transcendentals=int(B * 3 * Cout),
        bytes_accessed=int(x16.size * 2
                           + (wup_cat.size + w1_cat.size + w2_cat.size) * 2
                           + B * Cout * 4 * S * 4))

    out_pp = pl.pallas_call(
        kernel,
        out_shape=jax.ShapeDtypeStruct((B, Cout, 4 * S), jnp.float32),
        grid_spec=pltpu.PrefetchScalarGridSpec(
            num_scalar_prefetch=0,
            grid=(B,),
            in_specs=[
                pl.BlockSpec((1, Cin, S), lambda b: (b, 0, 0)),   # x (per batch)
                # Constant weight operands (~13 KB total): resident across the
                # batch grid.  The large gather/scatter constants from the
                # previous revision are gone, so default buffering is fine and
                # the default per-generation VMEM limit is left untouched
                # (fits v7x's 64 MiB/TC with large headroom).
                pl.BlockSpec((4 * Cout, Cin), lambda b: (0, 0)),  # up-conv taps
                pl.BlockSpec((Cout, 9 * Cout), lambda b: (0, 0)),  # conv1 taps
                pl.BlockSpec((Cout, 9 * Cout), lambda b: (0, 0)),  # conv2 taps
            ],
            out_specs=pl.BlockSpec((1, Cout, 4 * S), lambda b: (b, 0, 0)),
        ),
        compiler_params=pltpu.CompilerParams(
            dimension_semantics=("parallel",),
            vmem_limit_bytes=32 * 1024 * 1024),
        cost_estimate=cost,
    )(x16, wup_cat, w1_cat, w2_cat)

    # Parity-plane -> NCHW un-shuffle: pure XLA layout plumbing on a small
    # tensor (the kernel's stores stay lane-dense).
    out = out_pp.reshape(B, Cout, 2, 2, h, w)
    out = jnp.transpose(out, (0, 1, 4, 2, 5, 3)).reshape(B, Cout, 2 * h, 2 * w)
    return out


# ----------------------------------------------------------------------------
# Pure-JAX f32 reference mirroring the PyTorch module (eval mode).
# ----------------------------------------------------------------------------
def _reference(x, params, *, negative_slope=0.2, eps=1e-5):
    B, S, D = x.shape
    h = w = int(round(math.sqrt(S)))
    xi = x.reshape(B, h, w, D).transpose(0, 3, 1, 2)        # dimensional_change

    up_w = params['up_w']
    Cout = up_w.shape[1]
    up = jnp.zeros((B, Cout, 2 * h, 2 * w), jnp.float32)
    for kh in range(2):
        for kw in range(2):
            contrib = jnp.einsum('bchw,cd->bdhw', xi, up_w[:, :, kh, kw])
            up = up.at[:, :, kh::2, kw::2].set(contrib)

    def inorm(a):
        mu = a.mean(axis=(2, 3), keepdims=True)
        var = jnp.square(a - mu).mean(axis=(2, 3), keepdims=True)
        return (a - mu) / jnp.sqrt(var + eps)

    def lrelu(a):
        return jnp.where(a >= 0, a, negative_slope * a)

    def conv3(a, wgt):
        return jax.lax.conv_general_dilated(
            a, wgt, window_strides=(1, 1), padding=((1, 1), (1, 1)),
            dimension_numbers=('NCHW', 'OIHW', 'NCHW'))

    y = lrelu(inorm(up))
    y = lrelu(inorm(conv3(y, params['conv1_w'])))
    # Dropout2d(0.2) is identity in eval mode.
    y = lrelu(inorm(conv3(y, params['conv2_w'])))
    return y


if __name__ == "__main__":
    B = 2
    in_channels = 32                      # d_model
    out_channels = in_channels // 2       # module requires out = in // 2
    h = w = 4
    S = h * w                             # seq_length = 16

    key = jax.random.PRNGKey(0)
    kx, k1, k2, k3 = jax.random.split(key, 4)

    x = jax.random.normal(kx, (B, S, in_channels), dtype=jnp.float32)

    def uinit(k, shape, fan_in):
        bound = 1.0 / math.sqrt(fan_in)
        return jax.random.uniform(k, shape, jnp.float32, -bound, bound)

    params = {
        # ConvTranspose2d weight layout: (in_channels, out_channels, kH, kW)
        'up_w': uinit(k1, (in_channels, out_channels, 2, 2), in_channels * 4),
        # Conv2d weight layout: (out_channels, in_channels, kH, kW), no bias
        'conv1_w': uinit(k2, (out_channels, out_channels, 3, 3), out_channels * 9),
        'conv2_w': uinit(k3, (out_channels, out_channels, 3, 3), out_channels * 9),
    }

    out = transformer_decoder_forward(x, params)
    out = jax.block_until_ready(out)

    ref = _reference(x, params)
    assert out.shape == (B, out_channels, 2 * h, 2 * w)
    max_diff = float(jnp.max(jnp.abs(out - ref)))
    # bf16 MXU operands (f32 accumulation) through three matmul stages and
    # three instance norms; scatter/gather is now exact data movement, so the
    # tolerance is tighter than the previous all-bf16-matmul revision.
    assert jnp.allclose(out, ref, atol=5e-2, rtol=5e-2), (
        f"mismatch vs reference: max abs diff {max_diff}")

    print("KERNEL_OK")
</pallas_src>

<mosaic_0001>
module attributes {stable_mosaic.version = 11 : i64} {
  func.func @_decoder_kernel(%arg0: i32, %arg1: memref<1x32x16xbf16, #tpu.memory_space<vmem>>, %arg2: memref<64x32xbf16, #tpu.memory_space<vmem>>, %arg3: memref<16x144xbf16, #tpu.memory_space<vmem>>, %arg4: memref<16x144xbf16, #tpu.memory_space<vmem>>, %arg5: memref<1x16x64xf32, #tpu.memory_space<vmem>>) attributes {dimension_semantics = [#tpu.dimension_semantics<parallel>], iteration_bounds = array<i64: 2>, scalar_prefetch = 0 : i64, scratch_operands = 0 : i64, tpu.core_type = #tpu.core_type<tc>, window_params = [{transform_indices = @transform_0, window_bounds = array<i64: 1, 32, 16>}, {pipeline_mode = #tpu.pipeline_mode<synchronous>, transform_indices = @transform_1, window_bounds = array<i64: 64, 32>}, {pipeline_mode = #tpu.pipeline_mode<synchronous>, transform_indices = @transform_2, window_bounds = array<i64: 16, 144>}, {pipeline_mode = #tpu.pipeline_mode<synchronous>, transform_indices = @transform_3, window_bounds = array<i64: 16, 144>}, {transform_indices = @transform_4, window_bounds = array<i64: 1, 16, 64>}]} {
    %0 = tpu.iota {dimensions = array<i32: 1>} : vector<1x16xi32>
    %c4_i32 = arith.constant 4 : i32
    %c0_i32 = arith.constant 0 : i32
    %1 = arith.cmpi eq, %c4_i32, %c0_i32 : i32
    %c1_i32 = arith.constant 1 : i32
    %2 = arith.select %1, %c1_i32, %c4_i32 : i32
    %3 = vector.broadcast %2 : i32 to vector<1x16xi32>
    %4 = arith.remsi %0, %3 : vector<1x16xi32>
    %c0_i32_0 = arith.constant 0 : i32
    %5 = vector.broadcast %c0_i32_0 : i32 to vector<1x16xi32>
    %6 = arith.cmpi ne, %4, %5 : vector<1x16xi32>
    %c0_i32_1 = arith.constant 0 : i32
    %7 = vector.broadcast %c0_i32_1 : i32 to vector<1x16xi32>
    %8 = arith.cmpi slt, %4, %7 : vector<1x16xi32>
    %c0_i32_2 = arith.constant 0 : i32
    %9 = arith.cmpi slt, %2, %c0_i32_2 : i32
    %10 = vector.broadcast %9 : i1 to vector<1x16xi1>
    %11 = vector.broadcast %10 : vector<1x16xi1> to vector<1x16xi1>
    %12 = arith.xori %8, %11 : vector<1x16xi1>
    %13 = arith.andi %12, %6 : vector<1x16xi1>
    %14 = vector.broadcast %2 : i32 to vector<1x16xi32>
    %15 = arith.addi %4, %14 : vector<1x16xi32>
    %16 = arith.select %13, %15, %4 : vector<1x16xi1>, vector<1x16xi32>
    %c4_i32_3 = arith.constant 4 : i32
    %17 = vector.broadcast %c4_i32_3 : i32 to vector<1x16xi32>
    %18 = arith.cmpi sge, %0, %17 : vector<1x16xi32>
    %c12_i32 = arith.constant 12 : i32
    %19 = vector.broadcast %c12_i32 : i32 to vector<1x16xi32>
    %20 = arith.cmpi slt, %0, %19 : vector<1x16xi32>
    %c1_i32_4 = arith.constant 1 : i32
    %21 = vector.broadcast %c1_i32_4 : i32 to vector<1x16xi32>
    %22 = arith.cmpi sge, %16, %21 : vector<1x16xi32>
    %c3_i32 = arith.constant 3 : i32
    %23 = vector.broadcast %c3_i32 : i32 to vector<1x16xi32>
    %24 = arith.cmpi slt, %16, %23 : vector<1x16xi32>
    %c0 = arith.constant 0 : index
    %c0_5 = arith.constant 0 : index
    %c0_6 = arith.constant 0 : index
    %25 = vector.load %arg1[%c0, %c0_5, %c0_6] : memref<1x32x16xbf16, #tpu.memory_space<vmem>>, vector<1x32x16xbf16>
    %26 = vector.shape_cast %25 : vector<1x32x16xbf16> to vector<32x16xbf16>
    %c0_7 = arith.constant 0 : index
    %c0_8 = arith.constant 0 : index
    %27 = vector.load %arg2[%c0_7, %c0_8] : memref<64x32xbf16, #tpu.memory_space<vmem>>, vector<64x32xbf16>
    %cst = arith.constant dense<0.000000e+00> : vector<64x16xf32>
    %28 = tpu.matmul %27, %26, %cst {dimension_numbers = #tpu.dot_dimension_numbers<[1], [0], [0], [1], [0, 0, 1, 1], [], []>} : vector<64x32xbf16>, vector<32x16xbf16>, vector<64x16xf32> -> vector<64x16xf32>
    %29 = vector.extract_strided_slice %28 {offsets = [0, 0], sizes = [16, 16], strides = [1, 1]} : vector<64x16xf32> to vector<16x16xf32>
    %30 = vector.extract_strided_slice %28 {offsets = [16, 0], sizes = [16, 16], strides = [1, 1]} : vector<64x16xf32> to vector<16x16xf32>
    %31 = vector.extract_strided_slice %28 {offsets = [32, 0], sizes = [16, 16], strides = [1, 1]} : vector<64x16xf32> to vector<16x16xf32>
    %32 = vector.extract_strided_slice %28 {offsets = [48, 0], sizes = [16, 16], strides = [1, 1]} : vector<64x16xf32> to vector<16x16xf32>
    %33 = tpu.concatenate %29, %30, %31, %32 in 1 : vector<16x16xf32>, vector<16x16xf32>, vector<16x16xf32>, vector<16x16xf32> -> vector<16x64xf32>
    %cst_9 = arith.constant dense<0.000000e+00> : vector<16xf32>
    %34 = vector.multi_reduction <add>, %33, %cst_9 [1] : vector<16x64xf32> to vector<16xf32>
    %35 = vector.shape_cast %34 : vector<16xf32> to vector<16x1xf32>
    %cst_10 = arith.constant 1.562500e-02 : f32
    %36 = vector.broadcast %cst_10 : f32 to vector<16x1xf32>
    %37 = arith.mulf %35, %36 : vector<16x1xf32>
    %38 = vector.broadcast %37 : vector<16x1xf32> to vector<16x64xf32>
    %39 = arith.subf %33, %38 : vector<16x64xf32>
    %40 = arith.mulf %39, %39 : vector<16x64xf32>
    %cst_11 = arith.constant dense<0.000000e+00> : vector<16xf32>
    %41 = vector.multi_reduction <add>, %40, %cst_11 [1] : vector<16x64xf32> to vector<16xf32>
    %42 = vector.shape_cast %41 : vector<16xf32> to vector<16x1xf32>
    %cst_12 = arith.constant 1.562500e-02 : f32
    %43 = vector.broadcast %cst_12 : f32 to vector<16x1xf32>
    %44 = arith.mulf %42, %43 : vector<16x1xf32>
    %45 = vector.broadcast %37 : vector<16x1xf32> to vector<16x64xf32>
    %46 = arith.subf %33, %45 : vector<16x64xf32>
    %cst_13 = arith.constant 9.99999974E-6 : f32
    %47 = vector.broadcast %cst_13 : f32 to vector<16x1xf32>
    %48 = arith.addf %44, %47 : vector<16x1xf32>
    %49 = math.rsqrt %48 : vector<16x1xf32>
    %50 = vector.broadcast %49 : vector<16x1xf32> to vector<16x64xf32>
    %51 = arith.mulf %46, %50 : vector<16x64xf32>
    %cst_14 = arith.constant 0.000000e+00 : f32
    %52 = vector.broadcast %cst_14 : f32 to vector<16x64xf32>
    %53 = arith.cmpf oge, %51, %52 : vector<16x64xf32>
    %cst_15 = arith.constant 2.000000e-01 : f32
    %54 = vector.broadcast %cst_15 : f32 to vector<16x64xf32>
    %55 = arith.mulf %54, %51 : vector<16x64xf32>
    %56 = arith.select %53, %51, %55 : vector<16x64xi1>, vector<16x64xf32>
    %57 = arith.truncf %56 : vector<16x64xf32> to vector<16x64xbf16>
    %58 = vector.extract_strided_slice %57 {offsets = [0, 0], sizes = [16, 16], strides = [1, 1]} : vector<16x64xbf16> to vector<16x16xbf16>
    %59 = vector.extract_strided_slice %57 {offsets = [0, 16], sizes = [16, 16], strides = [1, 1]} : vector<16x64xbf16> to vector<16x16xbf16>
    %60 = vector.extract_strided_slice %57 {offsets = [0, 32], sizes = [16, 16], strides = [1, 1]} : vector<16x64xbf16> to vector<16x16xbf16>
    %61 = vector.extract_strided_slice %57 {offsets = [0, 48], sizes = [16, 16], strides = [1, 1]} : vector<16x64xbf16> to vector<16x16xbf16>
    %cst_16 = arith.constant 0.000000e+00 : bf16
    %62 = vector.broadcast %cst_16 : bf16 to vector<16x5xbf16>
    %63 = vector.extract_strided_slice %61 {offsets = [0, 0], sizes = [16, 11], strides = [1, 1]} : vector<16x16xbf16> to vector<16x11xbf16>
    %64 = tpu.concatenate %62, %63 in 1 : vector<16x5xbf16>, vector<16x11xbf16> -> vector<16x16xbf16>
    %65 = arith.andi %18, %22 : vector<1x16xi1>
    %cst_17 = arith.constant 0.000000e+00 : bf16
    %66 = vector.broadcast %cst_17 : bf16 to vector<16x16xbf16>
    %67 = vector.shape_cast %65 : vector<1x16xi1> to vector<1x16xi1>
    %68 = vector.broadcast %67 : vector<1x16xi1> to vector<16x16xi1>
    %69 = arith.select %68, %64, %66 : vector<16x16xi1>, vector<16x16xbf16>
    %cst_18 = arith.constant 0.000000e+00 : bf16
    %70 = vector.broadcast %cst_18 : bf16 to vector<16x4xbf16>
    %71 = vector.extract_strided_slice %60 {offsets = [0, 0], sizes = [16, 12], strides = [1, 1]} : vector<16x16xbf16> to vector<16x12xbf16>
    %72 = tpu.concatenate %70, %71 in 1 : vector<16x4xbf16>, vector<16x12xbf16> -> vector<16x16xbf16>
    %cst_19 = arith.constant 0.000000e+00 : bf16
    %73 = vector.broadcast %cst_19 : bf16 to vector<16x16xbf16>
    %74 = vector.shape_cast %18 : vector<1x16xi1> to vector<1x16xi1>
    %75 = vector.broadcast %74 : vector<1x16xi1> to vector<16x16xi1>
    %76 = arith.select %75, %72, %73 : vector<16x16xi1>, vector<16x16xbf16>
    %cst_20 = arith.constant 0.000000e+00 : bf16
    %77 = vector.broadcast %cst_20 : bf16 to vector<16x4xbf16>
    %78 = vector.extract_strided_slice %61 {offsets = [0, 0], sizes = [16, 12], strides = [1, 1]} : vector<16x16xbf16> to vector<16x12xbf16>
    %79 = tpu.concatenate %77, %78 in 1 : vector<16x4xbf16>, vector<16x12xbf16> -> vector<16x16xbf16>
    %cst_21 = arith.constant 0.000000e+00 : bf16
    %80 = vector.broadcast %cst_21 : bf16 to vector<16x16xbf16>
    %81 = vector.shape_cast %18 : vector<1x16xi1> to vector<1x16xi1>
    %82 = vector.broadcast %81 : vector<1x16xi1> to vector<16x16xi1>
    %83 = arith.select %82, %79, %80 : vector<16x16xi1>, vector<16x16xbf16>
    %cst_22 = arith.constant 0.000000e+00 : bf16
    %84 = vector.broadcast %cst_22 : bf16 to vector<16x1xbf16>
    %85 = vector.extract_strided_slice %59 {offsets = [0, 0], sizes = [16, 15], strides = [1, 1]} : vector<16x16xbf16> to vector<16x15xbf16>
    %86 = tpu.concatenate %84, %85 in 1 : vector<16x1xbf16>, vector<16x15xbf16> -> vector<16x16xbf16>
    %cst_23 = arith.constant 0.000000e+00 : bf16
    %87 = vector.broadcast %cst_23 : bf16 to vector<16x16xbf16>
    %88 = vector.shape_cast %22 : vector<1x16xi1> to vector<1x16xi1>
    %89 = vector.broadcast %88 : vector<1x16xi1> to vector<16x16xi1>
    %90 = arith.select %89, %86, %87 : vector<16x16xi1>, vector<16x16xbf16>
    %cst_24 = arith.constant 0.000000e+00 : bf16
    %91 = vector.broadcast %cst_24 : bf16 to vector<16x1xbf16>
    %92 = vector.extract_strided_slice %61 {offsets = [0, 0], sizes = [16, 15], strides = [1, 1]} : vector<16x16xbf16> to vector<16x15xbf16>
    %93 = tpu.concatenate %91, %92 in 1 : vector<16x1xbf16>, vector<16x15xbf16> -> vector<16x16xbf16>
    %cst_25 = arith.constant 0.000000e+00 : bf16
    %94 = vector.broadcast %cst_25 : bf16 to vector<16x16xbf16>
    %95 = vector.shape_cast %22 : vector<1x16xi1> to vector<1x16xi1>
    %96 = vector.broadcast %95 : vector<1x16xi1> to vector<16x16xi1>
    %97 = arith.select %96, %93, %94 : vector<16x16xi1>, vector<16x16xbf16>
    %98 = tpu.concatenate %69, %76, %83, %90, %58, %59, %97, %60, %61 in 0 : vector<16x16xbf16>, vector<16x16xbf16>, vector<16x16xbf16>, vector<16x16xbf16>, vector<16x16xbf16>, vector<16x16xbf16>, vector<16x16xbf16>, vector<16x16xbf16>, vector<16x16xbf16> -> vector<144x16xbf16>
    %cst_26 = arith.constant 0.000000e+00 : bf16
    %99 = vector.broadcast %cst_26 : bf16 to vector<16x4xbf16>
    %100 = vector.extract_strided_slice %60 {offsets = [0, 0], sizes = [16, 12], strides = [1, 1]} : vector<16x16xbf16> to vector<16x12xbf16>
    %101 = tpu.concatenate %99, %100 in 1 : vector<16x4xbf16>, vector<16x12xbf16> -> vector<16x16xbf16>
    %cst_27 = arith.constant 0.000000e+00 : bf16
    %102 = vector.broadcast %cst_27 : bf16 to vector<16x16xbf16>
    %103 = vector.shape_cast %18 : vector<1x16xi1> to vector<1x16xi1>
    %104 = vector.broadcast %103 : vector<1x16xi1> to vector<16x16xi1>
    %105 = arith.select %104, %101, %102 : vector<16x16xi1>, vector<16x16xbf16>
    %cst_28 = arith.constant 0.000000e+00 : bf16
    %106 = vector.broadcast %cst_28 : bf16 to vector<16x4xbf16>
    %107 = vector.extract_strided_slice %61 {offsets = [0, 0], sizes = [16, 12], strides = [1, 1]} : vector<16x16xbf16> to vector<16x12xbf16>
    %108 = tpu.concatenate %106, %107 in 1 : vector<16x4xbf16>, vector<16x12xbf16> -> vector<16x16xbf16>
    %cst_29 = arith.constant 0.000000e+00 : bf16
    %109 = vector.broadcast %cst_29 : bf16 to vector<16x16xbf16>
    %110 = vector.shape_cast %18 : vector<1x16xi1> to vector<1x16xi1>
    %111 = vector.broadcast %110 : vector<1x16xi1> to vector<16x16xi1>
    %112 = arith.select %111, %108, %109 : vector<16x16xi1>, vector<16x16xbf16>
    %cst_30 = arith.constant 0.000000e+00 : bf16
    %113 = vector.broadcast %cst_30 : bf16 to vector<16x3xbf16>
    %114 = vector.extract_strided_slice %60 {offsets = [0, 0], sizes = [16, 13], strides = [1, 1]} : vector<16x16xbf16> to vector<16x13xbf16>
    %115 = tpu.concatenate %113, %114 in 1 : vector<16x3xbf16>, vector<16x13xbf16> -> vector<16x16xbf16>
    %116 = arith.andi %18, %24 : vector<1x16xi1>
    %cst_31 = arith.constant 0.000000e+00 : bf16
    %117 = vector.broadcast %cst_31 : bf16 to vector<16x16xbf16>
    %118 = vector.shape_cast %116 : vector<1x16xi1> to vector<1x16xi1>
    %119 = vector.broadcast %118 : vector<1x16xi1> to vector<16x16xi1>
    %120 = arith.select %119, %115, %117 : vector<16x16xi1>, vector<16x16xbf16>
    %cst_32 = arith.constant 0.000000e+00 : bf16
    %121 = vector.broadcast %cst_32 : bf16 to vector<16x1xbf16>
    %122 = vector.extract_strided_slice %58 {offsets = [0, 1], sizes = [16, 15], strides = [1, 1]} : vector<16x16xbf16> to vector<16x15xbf16>
    %123 = tpu.concatenate %122, %121 in 1 : vector<16x15xbf16>, vector<16x1xbf16> -> vector<16x16xbf16>
    %cst_33 = arith.constant 0.000000e+00 : bf16
    %124 = vector.broadcast %cst_33 : bf16 to vector<16x16xbf16>
    %125 = vector.shape_cast %24 : vector<1x16xi1> to vector<1x16xi1>
    %126 = vector.broadcast %125 : vector<1x16xi1> to vector<16x16xi1>
    %127 = arith.select %126, %123, %124 : vector<16x16xi1>, vector<16x16xbf16>
    %cst_34 = arith.constant 0.000000e+00 : bf16
    %128 = vector.broadcast %cst_34 : bf16 to vector<16x1xbf16>
    %129 = vector.extract_strided_slice %60 {offsets = [0, 1], sizes = [16, 15], strides = [1, 1]} : vector<16x16xbf16> to vector<16x15xbf16>
    %130 = tpu.concatenate %129, %128 in 1 : vector<16x15xbf16>, vector<16x1xbf16> -> vector<16x16xbf16>
    %cst_35 = arith.constant 0.000000e+00 : bf16
    %131 = vector.broadcast %cst_35 : bf16 to vector<16x16xbf16>
    %132 = vector.shape_cast %24 : vector<1x16xi1> to vector<1x16xi1>
    %133 = vector.broadcast %132 : vector<1x16xi1> to vector<16x16xi1>
    %134 = arith.select %133, %130, %131 : vector<16x16xi1>, vector<16x16xbf16>
    %135 = tpu.concatenate %105, %112, %120, %58, %59, %127, %60, %61, %134 in 0 : vector<16x16xbf16>, vector<16x16xbf16>, vector<16x16xbf16>, vector<16x16xbf16>, vector<16x16xbf16>, vector<16x16xbf16>, vector<16x16xbf16>, vector<16x16xbf16>, vector<16x16xbf16> -> vector<144x16xbf16>
    %cst_36 = arith.constant 0.000000e+00 : bf16
    %136 = vector.broadcast %cst_36 : bf16 to vector<16x1xbf16>
    %137 = vector.extract_strided_slice %59 {offsets = [0, 0], sizes = [16, 15], strides = [1, 1]} : vector<16x16xbf16> to vector<16x15xbf16>
    %138 = tpu.concatenate %136, %137 in 1 : vector<16x1xbf16>, vector<16x15xbf16> -> vector<16x16xbf16>
    %cst_37 = arith.constant 0.000000e+00 : bf16
    %139 = vector.broadcast %cst_37 : bf16 to vector<16x16xbf16>
    %140 = vector.shape_cast %22 : vector<1x16xi1> to vector<1x16xi1>
    %141 = vector.broadcast %140 : vector<1x16xi1> to vector<16x16xi1>
    %142 = arith.select %141, %138, %139 : vector<16x16xi1>, vector<16x16xbf16>
    %cst_38 = arith.constant 0.000000e+00 : bf16
    %143 = vector.broadcast %cst_38 : bf16 to vector<16x1xbf16>
    %144 = vector.extract_strided_slice %61 {offsets = [0, 0], sizes = [16, 15], strides = [1, 1]} : vector<16x16xbf16> to vector<16x15xbf16>
    %145 = tpu.concatenate %143, %144 in 1 : vector<16x1xbf16>, vector<16x15xbf16> -> vector<16x16xbf16>
    %cst_39 = arith.constant 0.000000e+00 : bf16
    %146 = vector.broadcast %cst_39 : bf16 to vector<16x16xbf16>
    %147 = vector.shape_cast %22 : vector<1x16xi1> to vector<1x16xi1>
    %148 = vector.broadcast %147 : vector<1x16xi1> to vector<16x16xi1>
    %149 = arith.select %148, %145, %146 : vector<16x16xi1>, vector<16x16xbf16>
    %cst_40 = arith.constant 0.000000e+00 : bf16
    %150 = vector.broadcast %cst_40 : bf16 to vector<16x3xbf16>
    %151 = vector.extract_strided_slice %59 {offsets = [0, 3], sizes = [16, 13], strides = [1, 1]} : vector<16x16xbf16> to vector<16x13xbf16>
    %152 = tpu.concatenate %151, %150 in 1 : vector<16x13xbf16>, vector<16x3xbf16> -> vector<16x16xbf16>
    %153 = arith.andi %20, %22 : vector<1x16xi1>
    %cst_41 = arith.constant 0.000000e+00 : bf16
    %154 = vector.broadcast %cst_41 : bf16 to vector<16x16xbf16>
    %155 = vector.shape_cast %153 : vector<1x16xi1> to vector<1x16xi1>
    %156 = vector.broadcast %155 : vector<1x16xi1> to vector<16x16xi1>
    %157 = arith.select %156, %152, %154 : vector<16x16xi1>, vector<16x16xbf16>
    %cst_42 = arith.constant 0.000000e+00 : bf16
    %158 = vector.broadcast %cst_42 : bf16 to vector<16x4xbf16>
    %159 = vector.extract_strided_slice %58 {offsets = [0, 4], sizes = [16, 12], strides = [1, 1]} : vector<16x16xbf16> to vector<16x12xbf16>
    %160 = tpu.concatenate %159, %158 in 1 : vector<16x12xbf16>, vector<16x4xbf16> -> vector<16x16xbf16>
    %cst_43 = arith.constant 0.000000e+00 : bf16
    %161 = vector.broadcast %cst_43 : bf16 to vector<16x16xbf16>
    %162 = vector.shape_cast %20 : vector<1x16xi1> to vector<1x16xi1>
    %163 = vector.broadcast %162 : vector<1x16xi1> to vector<16x16xi1>
    %164 = arith.select %163, %160, %161 : vector<16x16xi1>, vector<16x16xbf16>
    %cst_44 = arith.constant 0.000000e+00 : bf16
    %165 = vector.broadcast %cst_44 : bf16 to vector<16x4xbf16>
    %166 = vector.extract_strided_slice %59 {offsets = [0, 4], sizes = [16, 12], strides = [1, 1]} : vector<16x16xbf16> to vector<16x12xbf16>
    %167 = tpu.concatenate %166, %165 in 1 : vector<16x12xbf16>, vector<16x4xbf16> -> vector<16x16xbf16>
    %cst_45 = arith.constant 0.000000e+00 : bf16
    %168 = vector.broadcast %cst_45 : bf16 to vector<16x16xbf16>
    %169 = vector.shape_cast %20 : vector<1x16xi1> to vector<1x16xi1>
    %170 = vector.broadcast %169 : vector<1x16xi1> to vector<16x16xi1>
    %171 = arith.select %170, %167, %168 : vector<16x16xi1>, vector<16x16xbf16>
    %172 = tpu.concatenate %142, %58, %59, %149, %60, %61, %157, %164, %171 in 0 : vector<16x16xbf16>, vector<16x16xbf16>, vector<16x16xbf16>, vector<16x16xbf16>, vector<16x16xbf16>, vector<16x16xbf16>, vector<16x16xbf16>, vector<16x16xbf16>, vector<16x16xbf16> -> vector<144x16xbf16>
    %cst_46 = arith.constant 0.000000e+00 : bf16
    %173 = vector.broadcast %cst_46 : bf16 to vector<16x1xbf16>
    %174 = vector.extract_strided_slice %58 {offsets = [0, 1], sizes = [16, 15], strides = [1, 1]} : vector<16x16xbf16> to vector<16x15xbf16>
    %175 = tpu.concatenate %174, %173 in 1 : vector<16x15xbf16>, vector<16x1xbf16> -> vector<16x16xbf16>
    %cst_47 = arith.constant 0.000000e+00 : bf16
    %176 = vector.broadcast %cst_47 : bf16 to vector<16x16xbf16>
    %177 = vector.shape_cast %24 : vector<1x16xi1> to vector<1x16xi1>
    %178 = vector.broadcast %177 : vector<1x16xi1> to vector<16x16xi1>
    %179 = arith.select %178, %175, %176 : vector<16x16xi1>, vector<16x16xbf16>
    %cst_48 = arith.constant 0.000000e+00 : bf16
    %180 = vector.broadcast %cst_48 : bf16 to vector<16x1xbf16>
    %181 = vector.extract_strided_slice %60 {offsets = [0, 1], sizes = [16, 15], strides = [1, 1]} : vector<16x16xbf16> to vector<16x15xbf16>
    %182 = tpu.concatenate %181, %180 in 1 : vector<16x15xbf16>, vector<16x1xbf16> -> vector<16x16xbf16>
    %cst_49 = arith.constant 0.000000e+00 : bf16
    %183 = vector.broadcast %cst_49 : bf16 to vector<16x16xbf16>
    %184 = vector.shape_cast %24 : vector<1x16xi1> to vector<1x16xi1>
    %185 = vector.broadcast %184 : vector<1x16xi1> to vector<16x16xi1>
    %186 = arith.select %185, %182, %183 : vector<16x16xi1>, vector<16x16xbf16>
    %cst_50 = arith.constant 0.000000e+00 : bf16
    %187 = vector.broadcast %cst_50 : bf16 to vector<16x4xbf16>
    %188 = vector.extract_strided_slice %58 {offsets = [0, 4], sizes = [16, 12], strides = [1, 1]} : vector<16x16xbf16> to vector<16x12xbf16>
    %189 = tpu.concatenate %188, %187 in 1 : vector<16x12xbf16>, vector<16x4xbf16> -> vector<16x16xbf16>
    %cst_51 = arith.constant 0.000000e+00 : bf16
    %190 = vector.broadcast %cst_51 : bf16 to vector<16x16xbf16>
    %191 = vector.shape_cast %20 : vector<1x16xi1> to vector<1x16xi1>
    %192 = vector.broadcast %191 : vector<1x16xi1> to vector<16x16xi1>
    %193 = arith.select %192, %189, %190 : vector<16x16xi1>, vector<16x16xbf16>
    %cst_52 = arith.constant 0.000000e+00 : bf16
    %194 = vector.broadcast %cst_52 : bf16 to vector<16x4xbf16>
    %195 = vector.extract_strided_slice %59 {offsets = [0, 4], sizes = [16, 12], strides = [1, 1]} : vector<16x16xbf16> to vector<16x12xbf16>
    %196 = tpu.concatenate %195, %194 in 1 : vector<16x12xbf16>, vector<16x4xbf16> -> vector<16x16xbf16>
    %cst_53 = arith.constant 0.000000e+00 : bf16
    %197 = vector.broadcast %cst_53 : bf16 to vector<16x16xbf16>
    %198 = vector.shape_cast %20 : vector<1x16xi1> to vector<1x16xi1>
    %199 = vector.broadcast %198 : vector<1x16xi1> to vector<16x16xi1>
    %200 = arith.select %199, %196, %197 : vector<16x16xi1>, vector<16x16xbf16>
    %cst_54 = arith.constant 0.000000e+00 : bf16
    %201 = vector.broadcast %cst_54 : bf16 to vector<16x5xbf16>
    %202 = vector.extract_strided_slice %58 {offsets = [0, 5], sizes = [16, 11], strides = [1, 1]} : vector<16x16xbf16> to vector<16x11xbf16>
    %203 = tpu.concatenate %202, %201 in 1 : vector<16x11xbf16>, vector<16x5xbf16> -> vector<16x16xbf16>
    %204 = arith.andi %20, %24 : vector<1x16xi1>
    %cst_55 = arith.constant 0.000000e+00 : bf16
    %205 = vector.broadcast %cst_55 : bf16 to vector<16x16xbf16>
    %206 = vector.shape_cast %204 : vector<1x16xi1> to vector<1x16xi1>
    %207 = vector.broadcast %206 : vector<1x16xi1> to vector<16x16xi1>
    %208 = arith.select %207, %203, %205 : vector<16x16xi1>, vector<16x16xbf16>
    %209 = tpu.concatenate %58, %59, %179, %60, %61, %186, %193, %200, %208 in 0 : vector<16x16xbf16>, vector<16x16xbf16>, vector<16x16xbf16>, vector<16x16xbf16>, vector<16x16xbf16>, vector<16x16xbf16>, vector<16x16xbf16>, vector<16x16xbf16>, vector<16x16xbf16> -> vector<144x16xbf16>
    %210 = tpu.concatenate %98, %135, %172, %209 in 1 : vector<144x16xbf16>, vector<144x16xbf16>, vector<144x16xbf16>, vector<144x16xbf16> -> vector<144x64xbf16>
    %c0_56 = arith.constant 0 : index
    %c0_57 = arith.constant 0 : index
    %211 = vector.load %arg3[%c0_56, %c0_57] : memref<16x144xbf16, #tpu.memory_space<vmem>>, vector<16x144xbf16>
    %cst_58 = arith.constant dense<0.000000e+00> : vector<16x64xf32>
    %212 = tpu.matmul %211, %210, %cst_58 {dimension_numbers = #tpu.dot_dimension_numbers<[1], [0], [0], [1], [0, 0, 1, 1], [], []>} : vector<16x144xbf16>, vector<144x64xbf16>, vector<16x64xf32> -> vector<16x64xf32>
    %cst_59 = arith.constant dense<0.000000e+00> : vector<16xf32>
    %213 = vector.multi_reduction <add>, %212, %cst_59 [1] : vector<16x64xf32> to vector<16xf32>
    %214 = vector.shape_cast %213 : vector<16xf32> to vector<16x1xf32>
    %cst_60 = arith.constant 1.562500e-02 : f32
    %215 = vector.broadcast %cst_60 : f32 to vector<16x1xf32>
    %216 = arith.mulf %214, %215 : vector<16x1xf32>
    %217 = vector.broadcast %216 : vector<16x1xf32> to vector<16x64xf32>
    %218 = arith.subf %212, %217 : vector<16x64xf32>
    %219 = arith.mulf %218, %218 : vector<16x64xf32>
    %cst_61 = arith.constant dense<0.000000e+00> : vector<16xf32>
    %220 = vector.multi_reduction <add>, %219, %cst_61 [1] : vector<16x64xf32> to vector<16xf32>
    %221 = vector.shape_cast %220 : vector<16xf32> to vector<16x1xf32>
    %cst_62 = arith.constant 1.562500e-02 : f32
    %222 = vector.broadcast %cst_62 : f32 to vector<16x1xf32>
    %223 = arith.mulf %221, %222 : vector<16x1xf32>
    %224 = vector.broadcast %216 : vector<16x1xf32> to vector<16x64xf32>
    %225 = arith.subf %212, %224 : vector<16x64xf32>
    %cst_63 = arith.constant 9.99999974E-6 : f32
    %226 = vector.broadcast %cst_63 : f32 to vector<16x1xf32>
    %227 = arith.addf %223, %226 : vector<16x1xf32>
    %228 = math.rsqrt %227 : vector<16x1xf32>
    %229 = vector.broadcast %228 : vector<16x1xf32> to vector<16x64xf32>
    %230 = arith.mulf %225, %229 : vector<16x64xf32>
    %cst_64 = arith.constant 0.000000e+00 : f32
    %231 = vector.broadcast %cst_64 : f32 to vector<16x64xf32>
    %232 = arith.cmpf oge, %230, %231 : vector<16x64xf32>
    %cst_65 = arith.constant 2.000000e-01 : f32
    %233 = vector.broadcast %cst_65 : f32 to vector<16x64xf32>
    %234 = arith.mulf %233, %230 : vector<16x64xf32>
    %235 = arith.select %232, %230, %234 : vector<16x64xi1>, vector<16x64xf32>
    %236 = arith.truncf %235 : vector<16x64xf32> to vector<16x64xbf16>
    %237 = vector.extract_strided_slice %236 {offsets = [0, 0], sizes = [16, 16], strides = [1, 1]} : vector<16x64xbf16> to vector<16x16xbf16>
    %238 = vector.extract_strided_slice %236 {offsets = [0, 16], sizes = [16, 16], strides = [1, 1]} : vector<16x64xbf16> to vector<16x16xbf16>
    %239 = vector.extract_strided_slice %236 {offsets = [0, 32], sizes = [16, 16], strides = [1, 1]} : vector<16x64xbf16> to vector<16x16xbf16>
    %240 = vector.extract_strided_slice %236 {offsets = [0, 48], sizes = [16, 16], strides = [1, 1]} : vector<16x64xbf16> to vector<16x16xbf16>
    %cst_66 = arith.constant 0.000000e+00 : bf16
    %241 = vector.broadcast %cst_66 : bf16 to vector<16x5xbf16>
    %242 = vector.extract_strided_slice %240 {offsets = [0, 0], sizes = [16, 11], strides = [1, 1]} : vector<16x16xbf16> to vector<16x11xbf16>
    %243 = tpu.concatenate %241, %242 in 1 : vector<16x5xbf16>, vector<16x11xbf16> -> vector<16x16xbf16>
    %244 = arith.andi %18, %22 : vector<1x16xi1>
    %cst_67 = arith.constant 0.000000e+00 : bf16
    %245 = vector.broadcast %cst_67 : bf16 to vector<16x16xbf16>
    %246 = vector.shape_cast %244 : vector<1x16xi1> to vector<1x16xi1>
    %247 = vector.broadcast %246 : vector<1x16xi1> to vector<16x16xi1>
    %248 = arith.select %247, %243, %245 : vector<16x16xi1>, vector<16x16xbf16>
    %cst_68 = arith.constant 0.000000e+00 : bf16
    %249 = vector.broadcast %cst_68 : bf16 to vector<16x4xbf16>
    %250 = vector.extract_strided_slice %239 {offsets = [0, 0], sizes = [16, 12], strides = [1, 1]} : vector<16x16xbf16> to vector<16x12xbf16>
    %251 = tpu.concatenate %249, %250 in 1 : vector<16x4xbf16>, vector<16x12xbf16> -> vector<16x16xbf16>
    %cst_69 = arith.constant 0.000000e+00 : bf16
    %252 = vector.broadcast %cst_69 : bf16 to vector<16x16xbf16>
    %253 = vector.shape_cast %18 : vector<1x16xi1> to vector<1x16xi1>
    %254 = vector.broadcast %253 : vector<1x16xi1> to vector<16x16xi1>
    %255 = arith.select %254, %251, %252 : vector<16x16xi1>, vector<16x16xbf16>
    %cst_70 = arith.constant 0.000000e+00 : bf16
    %256 = vector.broadcast %cst_70 : bf16 to vector<16x4xbf16>
    %257 = vector.extract_strided_slice %240 {offsets = [0, 0], sizes = [16, 12], strides = [1, 1]} : vector<16x16xbf16> to vector<16x12xbf16>
    %258 = tpu.concatenate %256, %257 in 1 : vector<16x4xbf16>, vector<16x12xbf16> -> vector<16x16xbf16>
    %cst_71 = arith.constant 0.000000e+00 : bf16
    %259 = vector.broadcast %cst_71 : bf16 to vector<16x16xbf16>
    %260 = vector.shape_cast %18 : vector<1x16xi1> to vector<1x16xi1>
    %261 = vector.broadcast %260 : vector<1x16xi1> to vector<16x16xi1>
    %262 = arith.select %261, %258, %259 : vector<16x16xi1>, vector<16x16xbf16>
    %cst_72 = arith.constant 0.000000e+00 : bf16
    %263 = vector.broadcast %cst_72 : bf16 to vector<16x1xbf16>
    %264 = vector.extract_strided_slice %238 {offsets = [0, 0], sizes = [16, 15], strides = [1, 1]} : vector<16x16xbf16> to vector<16x15xbf16>
    %265 = tpu.concatenate %263, %264 in 1 : vector<16x1xbf16>, vector<16x15xbf16> -> vector<16x16xbf16>
    %cst_73 = arith.constant 0.000000e+00 : bf16
    %266 = vector.broadcast %cst_73 : bf16 to vector<16x16xbf16>
    %267 = vector.shape_cast %22 : vector<1x16xi1> to vector<1x16xi1>
    %268 = vector.broadcast %267 : vector<1x16xi1> to vector<16x16xi1>
    %269 = arith.select %268, %265, %266 : vector<16x16xi1>, vector<16x16xbf16>
    %cst_74 = arith.constant 0.000000e+00 : bf16
    %270 = vector.broadcast %cst_74 : bf16 to vector<16x1xbf16>
    %271 = vector.extract_strided_slice %240 {offsets = [0, 0], sizes = [16, 15], strides = [1, 1]} : vector<16x16xbf16> to vector<16x15xbf16>
    %272 = tpu.concatenate %270, %271 in 1 : vector<16x1xbf16>, vector<16x15xbf16> -> vector<16x16xbf16>
    %cst_75 = arith.constant 0.000000e+00 : bf16
    %273 = vector.broadcast %cst_75 : bf16 to vector<16x16xbf16>
    %274 = vector.shape_cast %22 : vector<1x16xi1> to vector<1x16xi1>
    %275 = vector.broadcast %274 : vector<1x16xi1> to vector<16x16xi1>
    %276 = arith.select %275, %272, %273 : vector<16x16xi1>, vector<16x16xbf16>
    %277 = tpu.concatenate %248, %255, %262, %269, %237, %238, %276, %239, %240 in 0 : vector<16x16xbf16>, vector<16x16xbf16>, vector<16x16xbf16>, vector<16x16xbf16>, vector<16x16xbf16>, vector<16x16xbf16>, vector<16x16xbf16>, vector<16x16xbf16>, vector<16x16xbf16> -> vector<144x16xbf16>
    %cst_76 = arith.constant 0.000000e+00 : bf16
    %278 = vector.broadcast %cst_76 : bf16 to vector<16x4xbf16>
    %279 = vector.extract_strided_slice %239 {offsets = [0, 0], sizes = [16, 12], strides = [1, 1]} : vector<16x16xbf16> to vector<16x12xbf16>
    %280 = tpu.concatenate %278, %279 in 1 : vector<16x4xbf16>, vector<16x12xbf16> -> vector<16x16xbf16>
    %cst_77 = arith.constant 0.000000e+00 : bf16
    %281 = vector.broadcast %cst_77 : bf16 to vector<16x16xbf16>
    %282 = vector.shape_cast %18 : vector<1x16xi1> to vector<1x16xi1>
    %283 = vector.broadcast %282 : vector<1x16xi1> to vector<16x16xi1>
    %284 = arith.select %283, %280, %281 : vector<16x16xi1>, vector<16x16xbf16>
    %cst_78 = arith.constant 0.000000e+00 : bf16
    %285 = vector.broadcast %cst_78 : bf16 to vector<16x4xbf16>
    %286 = vector.extract_strided_slice %240 {offsets = [0, 0], sizes = [16, 12], strides = [1, 1]} : vector<16x16xbf16> to vector<16x12xbf16>
    %287 = tpu.concatenate %285, %286 in 1 : vector<16x4xbf16>, vector<16x12xbf16> -> vector<16x16xbf16>
    %cst_79 = arith.constant 0.000000e+00 : bf16
    %288 = vector.broadcast %cst_79 : bf16 to vector<16x16xbf16>
    %289 = vector.shape_cast %18 : vector<1x16xi1> to vector<1x16xi1>
    %290 = vector.broadcast %289 : vector<1x16xi1> to vector<16x16xi1>
    %291 = arith.select %290, %287, %288 : vector<16x16xi1>, vector<16x16xbf16>
    %cst_80 = arith.constant 0.000000e+00 : bf16
    %292 = vector.broadcast %cst_80 : bf16 to vector<16x3xbf16>
    %293 = vector.extract_strided_slice %239 {offsets = [0, 0], sizes = [16, 13], strides = [1, 1]} : vector<16x16xbf16> to vector<16x13xbf16>
    %294 = tpu.concatenate %292, %293 in 1 : vector<16x3xbf16>, vector<16x13xbf16> -> vector<16x16xbf16>
    %295 = arith.andi %18, %24 : vector<1x16xi1>
    %cst_81 = arith.constant 0.000000e+00 : bf16
    %296 = vector.broadcast %cst_81 : bf16 to vector<16x16xbf16>
    %297 = vector.shape_cast %295 : vector<1x16xi1> to vector<1x16xi1>
    %298 = vector.broadcast %297 : vector<1x16xi1> to vector<16x16xi1>
    %299 = arith.select %298, %294, %296 : vector<16x16xi1>, vector<16x16xbf16>
    %cst_82 = arith.constant 0.000000e+00 : bf16
    %300 = vector.broadcast %cst_82 : bf16 to vector<16x1xbf16>
    %301 = vector.extract_strided_slice %237 {offsets = [0, 1], sizes = [16, 15], strides = [1, 1]} : vector<16x16xbf16> to vector<16x15xbf16>
    %302 = tpu.concatenate %301, %300 in 1 : vector<16x15xbf16>, vector<16x1xbf16> -> vector<16x16xbf16>
    %cst_83 = arith.constant 0.000000e+00 : bf16
    %303 = vector.broadcast %cst_83 : bf16 to vector<16x16xbf16>
    %304 = vector.shape_cast %24 : vector<1x16xi1> to vector<1x16xi1>
    %305 = vector.broadcast %304 : vector<1x16xi1> to vector<16x16xi1>
    %306 = arith.select %305, %302, %303 : vector<16x16xi1>, vector<16x16xbf16>
    %cst_84 = arith.constant 0.000000e+00 : bf16
    %307 = vector.broadcast %cst_84 : bf16 to vector<16x1xbf16>
    %308 = vector.extract_strided_slice %239 {offsets = [0, 1], sizes = [16, 15], strides = [1, 1]} : vector<16x16xbf16> to vector<16x15xbf16>
    %309 = tpu.concatenate %308, %307 in 1 : vector<16x15xbf16>, vector<16x1xbf16> -> vector<16x16xbf16>
    %cst_85 = arith.constant 0.000000e+00 : bf16
    %310 = vector.broadcast %cst_85 : bf16 to vector<16x16xbf16>
    %311 = vector.shape_cast %24 : vector<1x16xi1> to vector<1x16xi1>
    %312 = vector.broadcast %311 : vector<1x16xi1> to vector<16x16xi1>
    %313 = arith.select %312, %309, %310 : vector<16x16xi1>, vector<16x16xbf16>
    %314 = tpu.concatenate %284, %291, %299, %237, %238, %306, %239, %240, %313 in 0 : vector<16x16xbf16>, vector<16x16xbf16>, vector<16x16xbf16>, vector<16x16xbf16>, vector<16x16xbf16>, vector<16x16xbf16>, vector<16x16xbf16>, vector<16x16xbf16>, vector<16x16xbf16> -> vector<144x16xbf16>
    %cst_86 = arith.constant 0.000000e+00 : bf16
    %315 = vector.broadcast %cst_86 : bf16 to vector<16x1xbf16>
    %316 = vector.extract_strided_slice %238 {offsets = [0, 0], sizes = [16, 15], strides = [1, 1]} : vector<16x16xbf16> to vector<16x15xbf16>
    %317 = tpu.concatenate %315, %316 in 1 : vector<16x1xbf16>, vector<16x15xbf16> -> vector<16x16xbf16>
    %cst_87 = arith.constant 0.000000e+00 : bf16
    %318 = vector.broadcast %cst_87 : bf16 to vector<16x16xbf16>
    %319 = vector.shape_cast %22 : vector<1x16xi1> to vector<1x16xi1>
    %320 = vector.broadcast %319 : vector<1x16xi1> to vector<16x16xi1>
    %321 = arith.select %320, %317, %318 : vector<16x16xi1>, vector<16x16xbf16>
    %cst_88 = arith.constant 0.000000e+00 : bf16
    %322 = vector.broadcast %cst_88 : bf16 to vector<16x1xbf16>
    %323 = vector.extract_strided_slice %240 {offsets = [0, 0], sizes = [16, 15], strides = [1, 1]} : vector<16x16xbf16> to vector<16x15xbf16>
    %324 = tpu.concatenate %322, %323 in 1 : vector<16x1xbf16>, vector<16x15xbf16> -> vector<16x16xbf16>
    %cst_89 = arith.constant 0.000000e+00 : bf16
    %325 = vector.broadcast %cst_89 : bf16 to vector<16x16xbf16>
    %326 = vector.shape_cast %22 : vector<1x16xi1> to vector<1x16xi1>
    %327 = vector.broadcast %326 : vector<1x16xi1> to vector<16x16xi1>
    %328 = arith.select %327, %324, %325 : vector<16x16xi1>, vector<16x16xbf16>
    %cst_90 = arith.constant 0.000000e+00 : bf16
    %329 = vector.broadcast %cst_90 : bf16 to vector<16x3xbf16>
    %330 = vector.extract_strided_slice %238 {offsets = [0, 3], sizes = [16, 13], strides = [1, 1]} : vector<16x16xbf16> to vector<16x13xbf16>
    %331 = tpu.concatenate %330, %329 in 1 : vector<16x13xbf16>, vector<16x3xbf16> -> vector<16x16xbf16>
    %332 = arith.andi %20, %22 : vector<1x16xi1>
    %cst_91 = arith.constant 0.000000e+00 : bf16
    %333 = vector.broadcast %cst_91 : bf16 to vector<16x16xbf16>
    %334 = vector.shape_cast %332 : vector<1x16xi1> to vector<1x16xi1>
    %335 = vector.broadcast %334 : vector<1x16xi1> to vector<16x16xi1>
    %336 = arith.select %335, %331, %333 : vector<16x16xi1>, vector<16x16xbf16>
    %cst_92 = arith.constant 0.000000e+00 : bf16
    %337 = vector.broadcast %cst_92 : bf16 to vector<16x4xbf16>
    %338 = vector.extract_strided_slice %237 {offsets = [0, 4], sizes = [16, 12], strides = [1, 1]} : vector<16x16xbf16> to vector<16x12xbf16>
    %339 = tpu.concatenate %338, %337 in 1 : vector<16x12xbf16>, vector<16x4xbf16> -> vector<16x16xbf16>
    %cst_93 = arith.constant 0.000000e+00 : bf16
    %340 = vector.broadcast %cst_93 : bf16 to vector<16x16xbf16>
    %341 = vector.shape_cast %20 : vector<1x16xi1> to vector<1x16xi1>
    %342 = vector.broadcast %341 : vector<1x16xi1> to vector<16x16xi1>
    %343 = arith.select %342, %339, %340 : vector<16x16xi1>, vector<16x16xbf16>
    %cst_94 = arith.constant 0.000000e+00 : bf16
    %344 = vector.broadcast %cst_94 : bf16 to vector<16x4xbf16>
    %345 = vector.extract_strided_slice %238 {offsets = [0, 4], sizes = [16, 12], strides = [1, 1]} : vector<16x16xbf16> to vector<16x12xbf16>
    %346 = tpu.concatenate %345, %344 in 1 : vector<16x12xbf16>, vector<16x4xbf16> -> vector<16x16xbf16>
    %cst_95 = arith.constant 0.000000e+00 : bf16
    %347 = vector.broadcast %cst_95 : bf16 to vector<16x16xbf16>
    %348 = vector.shape_cast %20 : vector<1x16xi1> to vector<1x16xi1>
    %349 = vector.broadcast %348 : vector<1x16xi1> to vector<16x16xi1>
    %350 = arith.select %349, %346, %347 : vector<16x16xi1>, vector<16x16xbf16>
    %351 = tpu.concatenate %321, %237, %238, %328, %239, %240, %336, %343, %350 in 0 : vector<16x16xbf16>, vector<16x16xbf16>, vector<16x16xbf16>, vector<16x16xbf16>, vector<16x16xbf16>, vector<16x16xbf16>, vector<16x16xbf16>, vector<16x16xbf16>, vector<16x16xbf16> -> vector<144x16xbf16>
    %cst_96 = arith.constant 0.000000e+00 : bf16
    %352 = vector.broadcast %cst_96 : bf16 to vector<16x1xbf16>
    %353 = vector.extract_strided_slice %237 {offsets = [0, 1], sizes = [16, 15], strides = [1, 1]} : vector<16x16xbf16> to vector<16x15xbf16>
    %354 = tpu.concatenate %353, %352 in 1 : vector<16x15xbf16>, vector<16x1xbf16> -> vector<16x16xbf16>
    %cst_97 = arith.constant 0.000000e+00 : bf16
    %355 = vector.broadcast %cst_97 : bf16 to vector<16x16xbf16>
    %356 = vector.shape_cast %24 : vector<1x16xi1> to vector<1x16xi1>
    %357 = vector.broadcast %356 : vector<1x16xi1> to vector<16x16xi1>
    %358 = arith.select %357, %354, %355 : vector<16x16xi1>, vector<16x16xbf16>
    %cst_98 = arith.constant 0.000000e+00 : bf16
    %359 = vector.broadcast %cst_98 : bf16 to vector<16x1xbf16>
    %360 = vector.extract_strided_slice %239 {offsets = [0, 1], sizes = [16, 15], strides = [1, 1]} : vector<16x16xbf16> to vector<16x15xbf16>
    %361 = tpu.concatenate %360, %359 in 1 : vector<16x15xbf16>, vector<16x1xbf16> -> vector<16x16xbf16>
    %cst_99 = arith.constant 0.000000e+00 : bf16
    %362 = vector.broadcast %cst_99 : bf16 to vector<16x16xbf16>
    %363 = vector.shape_cast %24 : vector<1x16xi1> to vector<1x16xi1>
    %364 = vector.broadcast %363 : vector<1x16xi1> to vector<16x16xi1>
    %365 = arith.select %364, %361, %362 : vector<16x16xi1>, vector<16x16xbf16>
    %cst_100 = arith.constant 0.000000e+00 : bf16
    %366 = vector.broadcast %cst_100 : bf16 to vector<16x4xbf16>
    %367 = vector.extract_strided_slice %237 {offsets = [0, 4], sizes = [16, 12], strides = [1, 1]} : vector<16x16xbf16> to vector<16x12xbf16>
    %368 = tpu.concatenate %367, %366 in 1 : vector<16x12xbf16>, vector<16x4xbf16> -> vector<16x16xbf16>
    %cst_101 = arith.constant 0.000000e+00 : bf16
    %369 = vector.broadcast %cst_101 : bf16 to vector<16x16xbf16>
    %370 = vector.shape_cast %20 : vector<1x16xi1> to vector<1x16xi1>
    %371 = vector.broadcast %370 : vector<1x16xi1> to vector<16x16xi1>
    %372 = arith.select %371, %368, %369 : vector<16x16xi1>, vector<16x16xbf16>
    %cst_102 = arith.constant 0.000000e+00 : bf16
    %373 = vector.broadcast %cst_102 : bf16 to vector<16x4xbf16>
    %374 = vector.extract_strided_slice %238 {offsets = [0, 4], sizes = [16, 12], strides = [1, 1]} : vector<16x16xbf16> to vector<16x12xbf16>
    %375 = tpu.concatenate %374, %373 in 1 : vector<16x12xbf16>, vector<16x4xbf16> -> vector<16x16xbf16>
    %cst_103 = arith.constant 0.000000e+00 : bf16
    %376 = vector.broadcast %cst_103 : bf16 to vector<16x16xbf16>
    %377 = vector.shape_cast %20 : vector<1x16xi1> to vector<1x16xi1>
    %378 = vector.broadcast %377 : vector<1x16xi1> to vector<16x16xi1>
    %379 = arith.select %378, %375, %376 : vector<16x16xi1>, vector<16x16xbf16>
    %cst_104 = arith.constant 0.000000e+00 : bf16
    %380 = vector.broadcast %cst_104 : bf16 to vector<16x5xbf16>
    %381 = vector.extract_strided_slice %237 {offsets = [0, 5], sizes = [16, 11], strides = [1, 1]} : vector<16x16xbf16> to vector<16x11xbf16>
    %382 = tpu.concatenate %381, %380 in 1 : vector<16x11xbf16>, vector<16x5xbf16> -> vector<16x16xbf16>
    %383 = arith.andi %20, %24 : vector<1x16xi1>
    %cst_105 = arith.constant 0.000000e+00 : bf16
    %384 = vector.broadcast %cst_105 : bf16 to vector<16x16xbf16>
    %385 = vector.shape_cast %383 : vector<1x16xi1> to vector<1x16xi1>
    %386 = vector.broadcast %385 : vector<1x16xi1> to vector<16x16xi1>
    %387 = arith.select %386, %382, %384 : vector<16x16xi1>, vector<16x16xbf16>
    %388 = tpu.concatenate %237, %238, %358, %239, %240, %365, %372, %379, %387 in 0 : vector<16x16xbf16>, vector<16x16xbf16>, vector<16x16xbf16>, vector<16x16xbf16>, vector<16x16xbf16>, vector<16x16xbf16>, vector<16x16xbf16>, vector<16x16xbf16>, vector<16x16xbf16> -> vector<144x16xbf16>
    %389 = tpu.concatenate %277, %314, %351, %388 in 1 : vector<144x16xbf16>, vector<144x16xbf16>, vector<144x16xbf16>, vector<144x16xbf16> -> vector<144x64xbf16>
    %c0_106 = arith.constant 0 : index
    %c0_107 = arith.constant 0 : index
    %390 = vector.load %arg4[%c0_106, %c0_107] : memref<16x144xbf16, #tpu.memory_space<vmem>>, vector<16x144xbf16>
    %cst_108 = arith.constant dense<0.000000e+00> : vector<16x64xf32>
    %391 = tpu.matmul %390, %389, %cst_108 {dimension_numbers = #tpu.dot_dimension_numbers<[1], [0], [0], [1], [0, 0, 1, 1], [], []>} : vector<16x144xbf16>, vector<144x64xbf16>, vector<16x64xf32> -> vector<16x64xf32>
    %cst_109 = arith.constant dense<0.000000e+00> : vector<16xf32>
    %392 = vector.multi_reduction <add>, %391, %cst_109 [1] : vector<16x64xf32> to vector<16xf32>
    %393 = vector.shape_cast %392 : vector<16xf32> to vector<16x1xf32>
    %cst_110 = arith.constant 1.562500e-02 : f32
    %394 = vector.broadcast %cst_110 : f32 to vector<16x1xf32>
    %395 = arith.mulf %393, %394 : vector<16x1xf32>
    %396 = vector.broadcast %395 : vector<16x1xf32> to vector<16x64xf32>
    %397 = arith.subf %391, %396 : vector<16x64xf32>
    %398 = arith.mulf %397, %397 : vector<16x64xf32>
    %cst_111 = arith.constant dense<0.000000e+00> : vector<16xf32>
    %399 = vector.multi_reduction <add>, %398, %cst_111 [1] : vector<16x64xf32> to vector<16xf32>
    %400 = vector.shape_cast %399 : vector<16xf32> to vector<16x1xf32>
    %cst_112 = arith.constant 1.562500e-02 : f32
    %401 = vector.broadcast %cst_112 : f32 to vector<16x1xf32>
    %402 = arith.mulf %400, %401 : vector<16x1xf32>
    %403 = vector.broadcast %395 : vector<16x1xf32> to vector<16x64xf32>
    %404 = arith.subf %391, %403 : vector<16x64xf32>
    %cst_113 = arith.constant 9.99999974E-6 : f32
    %405 = vector.broadcast %cst_113 : f32 to vector<16x1xf32>
    %406 = arith.addf %402, %405 : vector<16x1xf32>
    %407 = math.rsqrt %406 : vector<16x1xf32>
    %408 = vector.broadcast %407 : vector<16x1xf32> to vector<16x64xf32>
    %409 = arith.mulf %404, %408 : vector<16x64xf32>
    %cst_114 = arith.constant 0.000000e+00 : f32
    %410 = vector.broadcast %cst_114 : f32 to vector<16x64xf32>
    %411 = arith.cmpf oge, %409, %410 : vector<16x64xf32>
    %cst_115 = arith.constant 2.000000e-01 : f32
    %412 = vector.broadcast %cst_115 : f32 to vector<16x64xf32>
    %413 = arith.mulf %412, %409 : vector<16x64xf32>
    %414 = arith.select %411, %409, %413 : vector<16x64xi1>, vector<16x64xf32>
    %c0_116 = arith.constant 0 : index
    %c0_117 = arith.constant 0 : index
    %c0_118 = arith.constant 0 : index
    %415 = vector.load %arg5[%c0_116, %c0_117, %c0_118] : memref<1x16x64xf32, #tpu.memory_space<vmem>>, vector<1x16x64xf32>
    %416 = vector.shape_cast %415 : vector<1x16x64xf32> to vector<16x64xf32>
    %417 = vector.shape_cast %414 : vector<16x64xf32> to vector<1x16x64xf32>
    tpu.vector_store %arg5[%c0_116, %c0_117, %c0_118], %417 {strides = array<i32>} : memref<1x16x64xf32, #tpu.memory_space<vmem>>, vector<1x16x64xf32>,
    return
  }
  func.func @transform_0(%arg0: i32) -> (i32, i32, i32) {
    %c0_i32 = arith.constant 0 : i32
    %c0_i32_0 = arith.constant 0 : i32
    %c0_i32_1 = arith.constant 0 : i32
    return %arg0, %c0_i32, %c0_i32_0 : i32, i32, i32
  }
  func.func @transform_1(%arg0: i32) -> (i32, i32) {
    %c0_i32 = arith.constant 0 : i32
    %c0_i32_0 = arith.constant 0 : i32
    %c0_i32_1 = arith.constant 0 : i32
    return %c0_i32, %c0_i32_0 : i32, i32
  }
  func.func @transform_2(%arg0: i32) -> (i32, i32) {
    %c0_i32 = arith.constant 0 : i32
    %c0_i32_0 = arith.constant 0 : i32
    %c0_i32_1 = arith.constant 0 : i32
    return %c0_i32, %c0_i32_0 : i32, i32
  }
  func.func @transform_3(%arg0: i32) -> (i32, i32) {
    %c0_i32 = arith.constant 0 : i32
    %c0_i32_0 = arith.constant 0 : i32
    %c0_i32_1 = arith.constant 0 : i32
    return %c0_i32, %c0_i32_0 : i32, i32
  }
  func.func @transform_4(%arg0: i32) -> (i32, i32, i32) {
    %c0_i32 = arith.constant 0 : i32
    %c0_i32_0 = arith.constant 0 : i32
    %c0_i32_1 = arith.constant 0 : i32
    return %arg0, %c0_i32, %c0_i32_0 : i32, i32, i32
  }
}

</mosaic_0001>

<bundles_post_ra>
// kernel: tpu_custom_call.1
= control target key start
LH: loop header
LB: loop body
LE: loop exit
PB: predicated region body
PF: predicated region fallthrough
CT: control target
= control target key end

     0   :  { %9 = vsyncpa [#allocation3], 0  ;;  %s1995_s0 = inlined_call_operand.vmem [shape: bf16[2,32,16], index: 0, kind: input, shape index: {}]   ;;  %s1996_s1 = inlined_call_operand.vmem [shape: bf16[64,32], index: 1, kind: input, shape index: {}]   ;;  %s1997_s2 = inlined_call_operand.vmem [shape: bf16[16,144], index: 2, kind: input, shape index: {}]   ;;  %s1998_s3 = inlined_call_operand.vmem [shape: bf16[16,144], index: 3, kind: input, shape index: {}]   ;;  %s1999_s4 = inlined_call_operand.hbm [shape: f32[2,16,64], index: 4, kind: output, shape index: {}]  }
   0x1   :  { %11 = vsyncpa [#allocation3 + $0x1], 0  ;;  %s1418_s15 = smov 0   ;;  %s1420_s16 = smov 0  }
   0x2   :  { %s1422_s17 = smov 0   ;;  %s1424_s18 = smov 0  }
   0x3 LB: > { %s1439_s19 = sadd.s32 4294967295, %s1369_s18   ;;  %s1175_s20 = sadd.s32 4294967294, %s1369_s18   ;;  %s1369_s18 = sphi %s1424_s18, %s2075_s18   ;;  %s1365_s17 = sphi %s1422_s17, %s2074_s17   ;;  %s1361_s16 = sphi %s1420_s16, %s2073_s16   ;;  %s1357_s15 = sphi %s1418_s15, %s2072_s15  }
   0x4   : > { %s1443_s21 = sadd.s32 1, %s1369_s18   ;;  %s113_s22 = sadd.s32 1, %s1365_s17 }
   0x5   : > { %s110_s23 = ssub.s32 %s1369_s18, %s1443_s21  ;;  %p123_p0 = scmp.ne.s32.totalorder %s1365_s17, %s1361_s16 }
   0x6   : > { %p111_p1 = scmp.eq.s32.totalorder %s110_s23, 0  ;;  %p124_p2 = scmp.eq.s32.totalorder %s1439_s19, 1 }
   0x7   : > { %p129_p3 = scmp.ne.s32.totalorder %s1361_s16, %s1357_s15  ;;  %p130_p4 = scmp.eq.s32.totalorder %s1175_s20, 1 }
   0x8   : > { %s1454_s24 = scalar_select %p111_p1, %s1365_s17, %s113_s22  }
   0x9   : > { %p1456_p5 = por %p124_p2, %p123_p0  ;;  %p1460_p6 = por %p130_p4, %p129_p3 }
   0xa   : > { %p1178_p7 = scmp.ge.s32.totalorder %s1369_s18, 1  ;;  %p165_p8 = scmp.lt.s32.totalorder %s1369_s18, 3 }
   0xc   : > { %p166_p9 = pnand %p1178_p7, %p165_p8 }
   0xd   : > { %p191_p10 = scmp.lt.s32.totalorder (!%p166_p9), %s1439_s19, 1  ;;  %v1285_v0 = vld [vmem:[%s1996_s1] sm:$0xff] (!%p166_p9)   ;;  %vm261_vm0 = vcmask (!%p166_p9), 261120   ;;  %v1286_v3 = vld [vmem:[%s1996_s1 + $0x8] sm:$0xff] (!%p166_p9)   ;;  %v1287_v4 = vld [vmem:[%s1996_s1 + $0x10] sm:$0xff] (!%p166_p9)   ;;  %s1371_s14 = smov (!%p166_p9), 16   ;;  %v199_v54 = vlaneseq (!%p166_p9) }
   0xe   : > { %169 = sbr.rel (%p166_p9) target bundleno = 2340 (0x924), region = 36  ;;  %1215 = vmatprep.mubr.msk.bf16.mxu0 (!%p166_p9), %vm261_vm0, %v1285_v0  ;;  %v1288_v5 = vld [vmem:[%s1996_s1 + $0x18] sm:$0xff] (!%p166_p9)   ;;  %s1372_s20 = smov (!%p166_p9), 48   ;;  %vm363_vm1 = vcmask (!%p166_p9), 130048   ;;  %vm2005_vm2 = vcmask (!%p166_p9), 392192   ;;  %vm2004_vm3 = vcmask (!%p166_p9), 523264  }
   0xf   : > { %s1373_s22 = smov (!%p166_p9), 32   ;;  %v1374_v38 = vmov (!%p166_p9), 0   ;;  %s1375_s23 = smov (!%p166_p9), 113   ;;  %v1543_v55 = vand.u32 (!%p166_p9), 127, %v199_v54  ;;  %v419_v56 = vshrl.u32 (!%p166_p9), %v199_v54, 7  ;;  %vm2003_vm9 = vcmask (!%p166_p9), 31744  }
  0x10   : > { %720 = vmatprep.subr.bf16.mxu1 (!%p166_p9), %v1374_v38  ;;  %s1376_s27 = smov (!%p166_p9), 100   ;;  %s1377_s28 = smov (!%p166_p9), 99  }
  0x11   : > { %s1380_s5 = smov (!%p166_p9), 112   ;;  %s1381_s6 = smov (!%p166_p9), 80   ;;  %vm213_vm6 = vcmp.ge.s32.totalorder (!%p166_p9), %v1543_v55, 4  ;;  %v1549_v57 = vsub.s32 (!%p166_p9), 0, %v419_v56  ;;  %v205_v59 = vand.u32 (!%p166_p9), 3, %v1543_v55 }
  0x12   : > { %s1383_s8 = smov (!%p166_p9), 109   ;;  %s2000_s9 = smov (!%p166_p9), 96   ;;  %vm432_vm7 = vmpackc.low (!%p166_p9), %vm213_vm6, %vm213_vm6 }
  0x13   : > { %s1385_s10 = smov (!%p166_p9), 108   ;;  %s1386_s11 = smov (!%p166_p9), 95   ;;  %v433_v58 = vsel (!%p166_p9), %vm432_vm7, 65537, %v1374_v38  ;;  %vm1554_vm8 = vcmp.lt.s32.totalorder (!%p166_p9), %v205_v59, 3  ;;  %vm1558_vm10 = vcmp.ge.s32.totalorder (!%p166_p9), %v205_v59, 1 }
  0x14   : > { %s1387_s12 = smov (!%p166_p9), 85   ;;  %s2007_s13 = smov (!%p166_p9), 124   ;;  %v437_v60 = vrot.slane (!%p166_p9), %v433_v58, %v1549_v57  ;;  %vm480_vm12 = vmand (!%p166_p9), %vm213_vm6, %vm1554_vm8 }
  0x15   : > { %s192_s29 = scalar_select %p191_p10, %s1439_s19, 1  ;;  %vm454_vm13 = vmpackc.low %vm1558_vm10, %vm1558_vm10 }
  0x16   : > { %vm1562_vm11 = vcmp.ne.s16.totalorder %v437_v60, 0  ;;  %vm483_vm14 = vmpackc.low %vm480_vm12, %vm480_vm12 }
  0x17   : > { %s1203_s30 = sshll.u32 %s192_s29, 4  ;;  %s1378_s29 = smov 84   ;;  %vm499_vm15 = vmpackc.low %vm1554_vm8, %vm1554_vm8 }
  0x18   : > { %s195_s7 = scalar_lea.vmem %s1995_s0, %s1203_s30  ;;  %s1379_s30 = smov 81  }
  0x19   : > { %v1283_v1 = vld [vmem:[%s195_s7] sm:$0xff]   ;;  %v1284_v2 = vld [vmem:[%s195_s7 + $0x8] sm:$0xff]   ;;  %s1382_s7 = smov 127  }
  0x1a   : > { %1211 = vmatprep.subr.bf16.mxu0 %v1283_v1 }
  0x1b   : > { %1212 = vmatpush3.bf16.msra.mxu0 %v1283_v1 }
  0x1c   : > { %1213 = vmatprep.subr.bf16.mxu0 %v1284_v2 }
  0x1f   : > { %1214 = vmatpush3.bf16.msra.mxu0 %v1284_v2 }
  0x20   : > { %1024 = vmatprep.subr.bf16.mxu0 %v1374_v38 }
  0x22   : > { %1216 = vmatmul.mubr.msk.bf16.vlgmr.msra.gmra.mrb[0].mxu0 %vm261_vm0, %v1286_v3 }
  0x23   : > { %1219 = vmatprep.mubr.msk.bf16.mxu0 %vm261_vm0, %v1287_v4 }
  0x2a   : > { %1220 = vmatmul.mubr.msk.bf16.gmra.mrb[4].mxu0 %vm261_vm0, %v1288_v5 }
  0xf5   : > { %v1217_v6 = vpop.f32.mrb[0].mxu0 }
  0xf6   : > { %341 = vrot.lane.b32.xlu0 %v1217_v6, %s1371_s14  ;;  %v308_v7 = vpop.f32.mrb[1].mxu0  ;;  %v455_v6 = vsel %vm454_vm13, 65537, %v1374_v38  ;;  %vm493_vm13 = vcmask 121856  }
  0xf7   : > { %v1218_v8 = vpop.f32.mrb[2].mxu0 }
  0xf8   : > { %v311_v9 = vpop.f32.mrb[3].mxu0 }
  0xfa   : > { %343 = vrot.lane.b32.xlu0 %v1218_v8, %s1371_s14  ;;  %v459_v8 = vrot.slane %v455_v6, %v1549_v57 }
  0xfc   : > { %vm1594_vm7 = vcmp.ne.s16.totalorder %v459_v8, 0 }
  0xfd   : > { %v1221_v10 = vpop.f32.mrb[4].mxu0 }
  0xfe   : > { %357 = vrot.lane.b32.xlu0 %v1221_v10, %s1372_s20  ;;  %v324_v11 = vpop.f32.mrb[5].mxu0 }
  0xff   : > { %349 = vrot.lane.b32.xlu1 %v324_v11, %s1373_s22  ;;  %v1222_v12 = vpop.f32.mrb[6].mxu0 }
 0x100   : > { %v327_v13 = vpop.f32.mrb[7].mxu0 }
 0x103   : > { %351 = vrot.lane.b32.xlu1 %v327_v13, %s1373_s22 }
 0x107   : > { %359 = vrot.lane.b32.xlu1 %v1222_v12, %s1372_s20  ;;  %v500_v12 = vsel %vm499_vm15, 65537, %v1374_v38  ;;  %vm214_vm15 = vcmp.lt.s32.totalorder %v1543_v55, 12 }
 0x168   : > { %v342_v14 = vpop.permute.xlu0 %341 }
 0x169   : > { %v364_v16 = vsel %vm363_vm1, %v308_v7, %v342_v14  ;;  %v484_v7 = vsel %vm483_vm14, 65537, %v1374_v38 }
 0x16a   : > { %v488_v11 = vrot.slane %v484_v7, %v1549_v57 }
 0x16c   : > { %v344_v15 = vpop.permute.xlu0 %343  ;;  %vm1601_vm12 = vcmp.ne.s16.totalorder %v488_v11, 0 }
 0x16d   : > { %v365_v23 = vsel %vm363_vm1, %v311_v9, %v344_v15 }
 0x170   : > { %v358_v18 = vpop.permute.xlu0 %357 }
 0x171   : > { %v350_v17 = vpop.permute.xlu1 %349 }
 0x172   : > { %v366_v19 = vsel %vm261_vm0, %v364_v16, %v350_v17 }
 0x173   : > { %v369_v20 = vsel %vm2005_vm2, %v366_v19, %v358_v18  ;;  %v504_v19 = vrot.slane %v500_v12, %v1549_v57 }
 0x174   : > { %v372_v21 = vsel %vm2004_vm3, %v369_v20, 0.0 }
 0x175   : > { %373 = vadd.xlane.f32.xlu0 %v372_v21  ;;  %v352_v22 = vpop.permute.xlu1 %351  ;;  %vm1618_vm14 = vcmp.ne.s16.totalorder %v504_v19, 0 }
 0x176   : > { %v367_v24 = vsel %vm261_vm0, %v365_v23, %v352_v22 }
 0x179   : > { %v360_v25 = vpop.permute.xlu1 %359 }
 0x17a   : > { %v370_v26 = vsel %vm2005_vm2, %v367_v24, %v360_v25  ;;  %vm558_vm2 = vmand %vm214_vm15, %vm1554_vm8  ;;  %vm2009_vm8 = vcmask 105472  }
 0x17b   : > { %v375_v27 = vsel %vm2004_vm3, %v370_v26, 0.0 }
 0x17c   : > { %376 = vadd.xlane.f32.xlu1 %v375_v27 }
 0x202   : > { %v374_v28 = vpop.xlane.xlu0 %373 }
 0x203   : > { %v378_v29 = vmul.f32 0.015625, %v374_v28 }
 0x205   : > { %v380_v30 = vsub.f32 %v369_v20, %v378_v29 }
 0x207   : > { %v382_v31 = vmul.f32 %v380_v30, %v380_v30 }
 0x209   : > { %v377_v32 = vpop.xlane.xlu1 %376  ;;  %v384_v33 = vsel %vm2004_vm3, %v382_v31, 0.0 }
 0x20a   : > { %v379_v34 = vmul.f32 0.015625, %v377_v32  ;;  %385 = vadd.xlane.f32.xlu0 %v384_v33 }
 0x20c   : > { %v381_v35 = vsub.f32 %v370_v26, %v379_v34 }
 0x20e   : > { %v383_v36 = vmul.f32 %v381_v35, %v381_v35 }
 0x210   : > { %v387_v37 = vsel %vm2004_vm3, %v383_v36, 0.0  ;;  %vm2010_vm3 = vcmask 97280  }
 0x211   : > { %388 = vadd.xlane.f32.xlu0 %v387_v37 }
 0x297   : > { %v386_v39 = vpop.xlane.xlu0 %385 }
 0x298   : > { %v390_v40 = vmul.f32 0.015625, %v386_v39 }
 0x29a   : > { %v392_v41 = vadd.f32 1e-05, %v390_v40 }
 0x29c   : > { %1295 = vrsqrt.f32 %v392_v41 }
 0x29e   : > { %v389_v42 = vpop.xlane.xlu0 %388 }
 0x29f   : > { %v391_v43 = vmul.f32 0.015625, %v389_v42 }
 0x2a1   : > { %v393_v44 = vadd.f32 1e-05, %v391_v43 }
 0x2a3   : > { %1297 = vrsqrt.f32 %v393_v44 }
 0x2a6   : > { %v1296_v45 = vpop.eup %1295 }
 0x2a7   : > { %v396_v46 = vmul.f32 %v1296_v45, %v380_v30 }
 0x2a9   : > { %v400_v48 = vmul.f32 0.2, %v396_v46  ;;  %vm398_vm4 = vcmp.ge.f32.partialorder %v396_v46, 0.0 }
 0x2ab   : > { %v402_v51 = vsel %vm398_vm4, %v396_v46, %v400_v48  ;;  %vm2002_vm4 = vcmask 7168  }
 0x2ad   : > { %v1298_v47 = vpop.eup %1297 }
 0x2ae   : > { %v397_v49 = vmul.f32 %v1298_v47, %v381_v35 }
 0x2b0   : > { %vm399_vm5 = vcmp.ge.f32.partialorder %v397_v49, 0.0  ;;  %v401_v50 = vmul.f32 0.2, %v397_v49 }
 0x2b2   : > { %v403_v52 = vsel %vm399_vm5, %v397_v49, %v401_v50  ;;  %vm2001_vm5 = vcmask 23552   ;;  %v1291_v49 = vld [vmem:[%s1997_s2 + $0x4] ss:$8 sps:$4 sm:$0xff]  }
 0x2b3   : > { %v1505_v53 = vpack.c.bf16 %v403_v52, %v402_v51  ;;  %1194 = vmatprep.mubr.msk.bf16.mxu1 %vm363_vm1, %v1291_v49 }
 0x2b5   : > { %446 = vrot.lane.b32.xlu0 %v1505_v53, %s1375_s23  ;;  %424 = vrot.lane.b32.xlu1 %v1505_v53, %s1376_s27 }
 0x2b9   : > { %474 = vrot.lane.b32.xlu0 %v1505_v53, %s1377_s28  ;;  %440 = vrot.lane.b32.xlu1 %v1505_v53, %s1378_s29 }
 0x2bd   : > { %462 = vrot.lane.b32.xlu0 %v1505_v53, %s1379_s30  ;;  %468 = vrot.lane.b32.xlu1 %v1505_v53, %s1380_s5 }
 0x2c1   : > { %472 = vrot.lane.b32.xlu0 %v1505_v53, %s1381_s6  ;;  %491 = vrot.lane.b32.xlu1 %v1505_v53, %s1382_s7 }
 0x2c5   : > { %513 = vrot.lane.b32.xlu0 %v1505_v53, %s1383_s8  ;;  %470 = vrot.lane.b32.xlu1 %v1505_v53, %s2000_s9  ;;  %s2006_s9 = smov 123  }
 0x2c9   : > { %546 = vrot.lane.b32.xlu0 %v1505_v53, %s1385_s10  ;;  %507 = vrot.lane.b32.xlu1 %v1505_v53, %s1386_s11 }
 0x2cd   : > { %406 = vrot.lane.b32.xlu0 %v1505_v53, %s1387_s12  ;;  %530 = vrot.lane.b32.xlu1 %v1505_v53, %s2007_s13  ;;  %s1390_s13 = smov [#allocation2]  }
 0x2d1   : > { %580 = vrot.lane.b32.xlu0 %v1505_v53, %s1371_s14  ;;  %552 = vrot.lane.b32.xlu1 %v1505_v53, %s2006_s9 }
 0x2d5   : > { %616 = vrot.lane.b32.xlu1 %v1505_v53, %s1372_s20 }
 0x2d9   : > { %599 = vrot.lane.b32.xlu1 %v1505_v53, %s1373_s22 }
 0x327   : > { %v447_v0 = vpop.permute.xlu0 %446  ;;  %v425_v1 = vpop.permute.xlu1 %424 }
 0x328   : > { %v428_v2 = vsel %vm2003_vm9, 0, %v425_v1  ;;  %v450_v16 = vsel %vm2002_vm4, 0, %v447_v0 }
 0x329   : > { %v1576_v3 = vsel %vm1562_vm11, %v428_v2, 0  ;;  %v1613_v20 = vsel %vm1594_vm7, %v450_v16, 0 }
 0x32a   : > { %574 = vrot.lane.b32.xlu1 %v1576_v3, %s1371_s14 }
 0x32b   : > { %v475_v4 = vpop.permute.xlu0 %474  ;;  %v441_v5 = vpop.permute.xlu1 %440 }
 0x32c   : > { %v478_v18 = vsel %vm2001_vm5, 0, %v475_v4  ;;  %v443_v22 = vsel %vm2003_vm9, 0, %v441_v5  ;;  %vm538_vm5 = vmpackc.low %vm214_vm15, %vm214_vm15 }
 0x32d   : > { %v490_v21 = vsel %vm1601_vm12, %v478_v18, 0  ;;  %v1630_v26 = vsel %vm1562_vm11, %v443_v22, 0  ;;  %v539_v31 = vsel %vm538_vm5, 65537, %v1374_v38 }
 0x32e   : > { %v543_v33 = vrot.slane %v539_v31, %v1549_v57 }
 0x32f   : > { %v463_v9 = vpop.permute.xlu0 %462  ;;  %v1586_v10 = vpop.permute.xlu1 %468 }
 0x330   : > { %582 = vrot.lane.b32.xlu1 %v1586_v10, %s1371_s14  ;;  %618 = vrot.lane.b32.xlu0 %v1586_v10, %s1372_s20  ;;  %v465_v28 = vsel %vm2002_vm4, 0, %v463_v9  ;;  %vm519_vm4 = vmand %vm214_vm15, %vm1558_vm10  ;;  %vm1663_vm5 = vcmp.ne.s16.totalorder %v543_v33, 0 }
 0x331   : > { %v1640_v29 = vsel %vm1594_vm7, %v465_v28, 0  ;;  %vm522_vm9 = vmpackc.low %vm519_vm4, %vm519_vm4 }
 0x332   : > { %v523_v35 = vsel %vm522_vm9, 65537, %v1374_v38  ;;  %vm561_vm4 = vmpackc.low %vm558_vm2, %vm558_vm2  ;;  %vm2008_vm2 = vcmask 89088  }
 0x333   : > { %v1598_v14 = vpop.permute.xlu0 %472  ;;  %v492_v15 = vpop.permute.xlu1 %491  ;;  %v527_v40 = vrot.slane %v523_v35, %v1549_v57  ;;  %v562_v42 = vsel %vm561_vm4, 65537, %v1374_v38  ;;  %vm413_vm4 = vmand %vm213_vm6, %vm1558_vm10  ;;  %vm2033_vm6 = vcmask 392192  }
 0x334   : > { %624 = vrot.lane.b32.xlu1 %v1598_v14, %s1372_s20  ;;  %601 = vrot.lane.b32.xlu0 %v1586_v10, %s1373_s22  ;;  %v495_v24 = vsel %vm493_vm13, %v492_v15, 0  ;;  %v566_v46 = vrot.slane %v562_v42, %v1549_v57  ;;  %vm2034_vm10 = vmmov %vm2033_vm6 }
 0x335   : > { %v506_v27 = vsel %vm1618_vm14, %v495_v24, 0  ;;  %vm1676_vm9 = vcmp.ne.s16.totalorder %v527_v40, 0 }
 0x336   : > { %vm1691_vm15 = vcmp.ne.s16.totalorder %v566_v46, 0 }
 0x337   : > { %v1626_v25 = vpop.permute.xlu1 %470  ;;  %v514_v37 = vpop.permute.xlu0 %513 }
 0x338   : > { %578 = vrot.lane.b32.xlu1 %v490_v21, %s1371_s14  ;;  %597 = vrot.lane.b32.xlu0 %v1613_v20, %s1373_s22  ;;  %v517_v45 = vsel %vm2009_vm8, %v514_v37, 0  ;;  %vm408_vm8 = vcmask 39936  }
 0x339   : > { %v529_v50 = vsel %vm1676_vm9, %v517_v45, 0 }
 0x33b   : > { %v508_v30 = vpop.permute.xlu1 %507  ;;  %v547_v47 = vpop.permute.xlu0 %546 }
 0x33c   : > { %576 = vrot.lane.b32.xlu0 %v1630_v26, %s1371_s14  ;;  %620 = vrot.lane.b32.xlu1 %v506_v27, %s1372_s20  ;;  %v510_v41 = vsel %vm493_vm13, %v508_v30, 0  ;;  %v549_v51 = vsel %vm2010_vm3, %v547_v47, 0 }
 0x33d   : > { %v512_v43 = vsel %vm1618_vm14, %v510_v41, 0  ;;  %v551_v56 = vsel %vm1663_vm5, %v549_v51, 0 }
 0x33f   : > { %v531_v32 = vpop.permute.xlu1 %530  ;;  %v407_v60 = vpop.permute.xlu0 %406 }
 0x340   : > { %603 = vrot.lane.b32.xlu1 %v1640_v29, %s1373_s22  ;;  %622 = vrot.lane.b32.xlu0 %v1626_v25, %s1372_s20  ;;  %v534_v34 = vsel %vm2010_vm3, %v531_v32, 0  ;;  %v411_v62 = vsel %vm408_vm8, 0, %v407_v60 }
 0x341   : > { %v545_v39 = vsel %vm1663_vm5, %v534_v34, 0 }
 0x343   : > { %v553_v48 = vpop.permute.xlu1 %552  ;;  %v581_v0 = vpop.permute.xlu0 %580 }
 0x344   : > { %607 = vrot.lane.b32.xlu1 %v1598_v14, %s1373_s22  ;;  %605 = vrot.lane.b32.xlu0 %v1626_v25, %s1373_s22  ;;  %v556_v54 = vsel %vm2008_vm2, %v553_v48, 0  ;;  %vm416_vm2 = vmpackc.low %vm413_vm4, %vm413_vm4  ;;  %v645_v32 = vsel %vm363_vm1, %v1613_v20, %v581_v0 }
 0x345   : > { %v568_v58 = vsel %vm1691_vm15, %v556_v54, 0  ;;  %v417_v2 = vsel %vm416_vm2, 65537, %v1374_v38  ;;  %vm2035_vm2 = vmmov %vm2033_vm6 }
 0x346   : > { %v421_v4 = vrot.slane %v417_v2, %v1549_v57  ;;  %vm2036_vm4 = vmmov %vm2035_vm2  ;;  %v1289_v2 = vld [vmem:[%s1997_s2] ss:$8 sps:$4 sm:$0xff]  }
 0x347   : > { %v617_v59 = vpop.permute.xlu1 %616 }
 0x348   : > { %586 = vrot.lane.b32.xlu1 %v1626_v25, %s1371_s14  ;;  %588 = vrot.lane.b32.xlu0 %v1598_v14, %s1371_s14  ;;  %vm1711_vm3 = vcmp.ne.s16.totalorder %v421_v4, 0 }
 0x349   : > { %v423_v9 = vsel %vm1711_vm3, %v411_v62, 0 }
 0x34b   : > { %v600_v61 = vpop.permute.xlu1 %599 }
 0x34c   : > { %584 = vrot.lane.b32.xlu0 %v506_v27, %s1371_s14  ;;  %628 = vrot.lane.b32.xlu1 %v545_v39, %s1372_s20 }
 0x350   : > { %626 = vrot.lane.b32.xlu0 %v512_v43, %s1372_s20  ;;  %611 = vrot.lane.b32.xlu1 %v545_v39, %s1373_s22 }
 0x354   : > { %609 = vrot.lane.b32.xlu0 %v529_v50, %s1373_s22  ;;  %590 = vrot.lane.b32.xlu1 %v512_v43, %s1371_s14 }
 0x358   : > { %630 = vrot.lane.b32.xlu0 %v551_v56, %s1372_s20  ;;  %632 = vrot.lane.b32.xlu1 %v568_v58, %s1372_s20 }
 0x35c   : > { %613 = vrot.lane.b32.xlu0 %v551_v56, %s1373_s22 }
 0x39c   : > { %v575_v1 = vpop.permute.xlu1 %574 }
 0x39d   : > { %v636_v11 = vsel %vm363_vm1, %v423_v9, %v575_v1 }
 0x3a2   : > { %v619_v5 = vpop.permute.xlu0 %618  ;;  %v583_v6 = vpop.permute.xlu1 %582 }
 0x3a6   : > { %v602_v8 = vpop.permute.xlu0 %601  ;;  %v625_v55 = vpop.permute.xlu1 %624 }
 0x3aa   : > { %v598_v12 = vpop.permute.xlu0 %597  ;;  %v579_v15 = vpop.permute.xlu1 %578 }
 0x3ab   : > { %v662_v57 = vsel %vm261_vm0, %v636_v11, %v598_v12  ;;  %v642_v24 = vsel %vm363_vm1, %v1630_v26, %v579_v15  ;;  %v648_v26 = vsel %vm363_vm1, %v1505_v53, %v583_v6 }
 0x3ac   : > { %v680_v16 = vsel %vm2033_vm6, %v662_v57, %v617_v59  ;;  %v666_v31 = vsel %vm261_vm0, %v642_v24, %v602_v8  ;;  %vm2037_vm6 = vmmov %vm2035_vm2 }
 0x3ad   : > { %721 = vmatpush1.bf16.msra.mxu1 %v680_v16 }
 0x3ae   : > { %v577_v18 = vpop.permute.xlu0 %576  ;;  %v621_v19 = vpop.permute.xlu1 %620  ;;  %722 = vmatprep.subr.bf16.mxu1 %v1374_v38 }
 0x3af   : > { %v639_v21 = vsel %vm363_vm1, %v1576_v3, %v577_v18  ;;  %v686_v33 = vsel %vm2035_vm2, %v666_v31, %v621_v19 }
 0x3b0   : > { %v664_v22 = vsel %vm261_vm0, %v639_v21, %v600_v61 }
 0x3b1   : > { %v683_v27 = vsel %vm2034_vm10, %v664_v22, %v619_v5  ;;  %vm2038_vm10 = vmmov %vm2035_vm2 }
 0x3b2   : > { %v623_v28 = vpop.permute.xlu0 %622  ;;  %723 = vmatpush1.bf16.msra.mxu1 %v683_v27  ;;  %v604_v30 = vpop.permute.xlu1 %603 }
 0x3b3   : > { %724 = vmatprep.subr.bf16.mxu1 %v1374_v38  ;;  %v668_v3 = vsel %vm261_vm0, %v645_v32, %v604_v30 }
 0x3b4   : > { %v689_v37 = vsel %vm2036_vm4, %v668_v3, %v623_v28  ;;  %vm2039_vm4 = vmmov %vm2035_vm2 }
 0x3b6   : > { %v606_v34 = vpop.permute.xlu0 %605  ;;  %725 = vmatpush1.bf16.msra.mxu1 %v686_v33  ;;  %v608_v35 = vpop.permute.xlu1 %607 }
 0x3b7   : > { %726 = vmatprep.subr.bf16.mxu1 %v1374_v38  ;;  %v670_v39 = vsel %vm261_vm0, %v648_v26, %v606_v34 }
 0x3b8   : > { %v692_v20 = vsel %vm2037_vm6, %v670_v39, %v625_v55  ;;  %vm2040_vm6 = vmmov %vm2035_vm2 }
 0x3ba   : > { %v589_v40 = vpop.permute.xlu0 %588  ;;  %727 = vmatpush1.bf16.msra.mxu1 %v689_v37  ;;  %v587_v41 = vpop.permute.xlu1 %586 }
 0x3bb   : > { %728 = vmatprep.subr.bf16.mxu1 %v1374_v38  ;;  %v654_v49 = vsel %vm363_vm1, %v1640_v29, %v587_v41 }
 0x3be   : > { %v585_v42 = vpop.permute.xlu0 %584  ;;  %729 = vmatpush1.bf16.msra.mxu1 %v692_v20  ;;  %v629_v43 = vpop.permute.xlu1 %628 }
 0x3bf   : > { %v651_v45 = vsel %vm363_vm1, %v1586_v10, %v585_v42  ;;  %730 = vmatprep.subr.bf16.mxu1 %v1374_v38  ;;  %v657_v10 = vsel %vm363_vm1, %v1626_v25, %v589_v40 }
 0x3c0   : > { %v672_v46 = vsel %vm261_vm0, %v651_v45, %v608_v35 }
 0x3c2   : > { %v627_v53 = vpop.permute.xlu0 %626  ;;  %v612_v47 = vpop.permute.xlu1 %611 }
 0x3c3   : > { %v695_v48 = vsel %vm2038_vm10, %v672_v46, %v627_v53  ;;  %v676_v58 = vsel %vm261_vm0, %v657_v10, %v612_v47  ;;  %vm2041_vm10 = vcmask 523264  }
 0x3c4   : > { %731 = vmatpush1.bf16.msra.mxu1 %v695_v48 }
 0x3c5   : > { %732 = vmatprep.subr.bf16.mxu1 %v1374_v38 }
 0x3c6   : > { %v610_v50 = vpop.permute.xlu0 %609  ;;  %v591_v56 = vpop.permute.xlu1 %590 }
 0x3c7   : > { %v674_v51 = vsel %vm261_vm0, %v654_v49, %v610_v50  ;;  %v660_v29 = vsel %vm363_vm1, %v1598_v14, %v591_v56 }
 0x3c8   : > { %v698_v54 = vsel %vm2035_vm2, %v674_v51, %v629_v43  ;;  %vm2042_vm2 = vmmov %vm2041_vm10 }
 0x3c9   : > { %733 = vmatpush1.bf16.msra.mxu1 %v698_v54 }
 0x3ca   : > { %v631_v59 = vpop.permute.xlu0 %630  ;;  %734 = vmatprep.subr.bf16.mxu1 %v1374_v38  ;;  %v633_v0 = vpop.permute.xlu1 %632 }
 0x3cb   : > { %v701_v60 = vsel %vm2039_vm4, %v676_v58, %v631_v59  ;;  %vm2043_vm4 = vmmov %vm2042_vm2 }
 0x3cd   : > { %735 = vmatpush1.bf16.msra.mxu1 %v701_v60 }
 0x3ce   : > { %v614_v61 = vpop.permute.xlu0 %613  ;;  %736 = vmatprep.subr.bf16.mxu1 %v1374_v38 }
 0x3cf   : > { %v678_v1 = vsel %vm261_vm0, %v660_v29, %v614_v61 }
 0x3d0   : > { %v704_v25 = vsel %vm2040_vm6, %v678_v1, %v633_v0  ;;  %vm2044_vm6 = vmmov %vm2042_vm2 }
 0x3d1   : > { %737 = vmatpush1.bf16.msra.mxu1 %v704_v25 }
 0x3d4   : > { %753 = vmatmul.mubr.bf16.vlgmr.msra.gmra.mrb[0].mxu1 %v1289_v2 }
 0x4a7   : > { %v754_v4 = vpop.f32.mrb[0].mxu1 }
 0x4a8   : > { %v756_v5 = vpop.f32.mrb[1].mxu1  ;;  %v761_v6 = vsel %vm2041_vm10, %v754_v4, 0.0 }
 0x4a9   : > { %762 = vadd.xlane.f32.xlu0 %v761_v6  ;;  %v757_v14 = vpop.f32.mrb[2].mxu1 }
 0x4aa   : > { %v759_v62 = vpop.f32.mrb[3].mxu1  ;;  %v764_v8 = vsel %vm2042_vm2, %v757_v14, 0.0 }
 0x4ab   : > { %765 = vadd.xlane.f32.xlu1 %v764_v8  ;;  %v1294_v62 = vld [vmem:[%s1998_s3 + $0x4] ss:$8 sps:$4 sm:$0xff]  }
 0x4ac   : > { %1197 = vmatprep.mubr.msk.bf16.mxu0 %vm363_vm1, %v1294_v62 }
 0x536   : > { %v763_v55 = vpop.xlane.xlu0 %762 }
 0x537   : > { %v767_v9 = vmul.f32 0.015625, %v763_v55 }
 0x538   : > { %v766_v11 = vpop.xlane.xlu1 %765 }
 0x539   : > { %v769_v12 = vsub.f32 %v754_v4, %v767_v9  ;;  %v768_v15 = vmul.f32 0.015625, %v766_v11 }
 0x53b   : > { %v770_v57 = vsub.f32 %v757_v14, %v768_v15  ;;  %v771_v16 = vmul.f32 %v769_v12, %v769_v12 }
 0x53d   : > { %v773_v18 = vsel %vm2043_vm4, %v771_v16, 0.0  ;;  %v772_v19 = vmul.f32 %v770_v57, %v770_v57  ;;  %vm2048_vm4 = vcmask 31744  }
 0x53e   : > { %774 = vadd.xlane.f32.xlu0 %v773_v18 }
 0x53f   : > { %v776_v21 = vsel %vm2044_vm6, %v772_v19, 0.0  ;;  %vm2049_vm6 = vcmask 7168  }
 0x542   : > { %777 = vadd.xlane.f32.xlu0 %v776_v21 }
 0x5cb   : > { %v775_v22 = vpop.xlane.xlu0 %774 }
 0x5cc   : > { %v779_v24 = vmul.f32 0.015625, %v775_v22 }
 0x5ce   : > { %v781_v27 = vadd.f32 1e-05, %v779_v24 }
 0x5cf   : > { %v778_v28 = vpop.xlane.xlu0 %777 }
 0x5d0   : > { %1299 = vrsqrt.f32 %v781_v27  ;;  %v780_v30 = vmul.f32 0.015625, %v778_v28 }
 0x5d2   : > { %v782_v31 = vadd.f32 1e-05, %v780_v30 }
 0x5d4   : > { %1301 = vrsqrt.f32 %v782_v31 }
 0x5da   : > { %v1300_v32 = vpop.eup %1299 }
 0x5db   : > { %v785_v33 = vmul.f32 %v1300_v32, %v769_v12 }
 0x5dd   : > { %v789_v34 = vmul.f32 0.2, %v785_v33  ;;  %vm787_vm10 = vcmp.ge.f32.partialorder %v785_v33, 0.0 }
 0x5de   : > { %v1302_v3 = vpop.eup %1301 }
 0x5df   : > { %v786_v35 = vmul.f32 %v1302_v3, %v770_v57  ;;  %v791_v37 = vsel %vm787_vm10, %v785_v33, %v789_v34  ;;  %vm2050_vm10 = vcmask 23552  }
 0x5e1   : > { %vm788_vm2 = vcmp.ge.f32.partialorder %v786_v35, 0.0  ;;  %v790_v26 = vmul.f32 0.2, %v786_v35 }
 0x5e3   : > { %v792_v39 = vsel %vm788_vm2, %v786_v35, %v790_v26  ;;  %vm2051_vm2 = vmmov %vm2048_vm4 }
 0x5e4   : > { %v1768_v40 = vpack.c.bf16 %v792_v39, %v791_v37 }
 0x5e6   : > { %813 = vrot.lane.b32.xlu0 %v1768_v40, %s1375_s23  ;;  %801 = vrot.lane.b32.xlu1 %v1768_v40, %s1376_s27  ;;  %s2045_s23 = smov 96   ;;  %s2046_s27 = smov 124  }
 0x5ea   : > { %831 = vrot.lane.b32.xlu0 %v1768_v40, %s1377_s28  ;;  %807 = vrot.lane.b32.xlu1 %v1768_v40, %s1378_s29  ;;  %s2047_s28 = smov 123  }
 0x5ee   : > { %819 = vrot.lane.b32.xlu0 %v1768_v40, %s1379_s30  ;;  %825 = vrot.lane.b32.xlu1 %v1768_v40, %s1380_s5 }
 0x5f2   : > { %829 = vrot.lane.b32.xlu0 %v1768_v40, %s1381_s6  ;;  %837 = vrot.lane.b32.xlu1 %v1768_v40, %s1382_s7  ;;  %s1204_s6 = sshll.u32 %s1439_s19, 8 }
 0x5f6   : > { %849 = vrot.lane.b32.xlu0 %v1768_v40, %s1383_s8  ;;  %827 = vrot.lane.b32.xlu1 %v1768_v40, %s2045_s23  ;;  %s1311_s23 = sshll.u32 %s1390_s13, 4  ;;  %s1312_s23 = int_to_ptr.vmem [resolvable:$false] %s1311_s23 }
 0x5fa   : > { %861 = vrot.lane.b32.xlu0 %v1768_v40, %s1385_s10  ;;  %843 = vrot.lane.b32.xlu1 %v1768_v40, %s1386_s11 }
 0x5fe   : > { %795 = vrot.lane.b32.xlu0 %v1768_v40, %s1387_s12  ;;  %855 = vrot.lane.b32.xlu1 %v1768_v40, %s2046_s27  ;;  %s1949_s12 = scalar_lea.hbm %s1999_s4, %s1204_s6  ;;  %s1313_s27 = scalar_lea.vmem %s1312_s23, 512 }
 0x602   : > { %884 = vrot.lane.b32.xlu0 %v1768_v40, %s1371_s14  ;;  %867 = vrot.lane.b32.xlu1 %v1768_v40, %s2047_s28 }
 0x606   : > { %920 = vrot.lane.b32.xlu1 %v1768_v40, %s1372_s20 }
 0x60a   : > { %903 = vrot.lane.b32.xlu1 %v1768_v40, %s1373_s22 }
 0x658   : > { %v814_v41 = vpop.permute.xlu0 %813  ;;  %v802_v20 = vpop.permute.xlu1 %801 }
 0x659   : > { %v804_v42 = vsel %vm2048_vm4, 0, %v802_v20  ;;  %v816_v50 = vsel %vm2049_vm6, 0, %v814_v41  ;;  %vm2052_vm4 = vmmov %vm2049_vm6 }
 0x65a   : > { %v1809_v43 = vsel %vm1562_vm11, %v804_v42, 0  ;;  %v1829_v54 = vsel %vm1594_vm7, %v816_v50, 0 }
 0x65b   : > { %878 = vrot.lane.b32.xlu1 %v1809_v43, %s1371_s14 }
 0x65c   : > { %v832_v45 = vpop.permute.xlu0 %831  ;;  %v808_v53 = vpop.permute.xlu1 %807 }
 0x65d   : > { %v834_v51 = vsel %vm2050_vm10, 0, %v832_v45  ;;  %v810_v56 = vsel %vm2051_vm2, 0, %v808_v53 }
 0x65e   : > { %v836_v10 = vsel %vm1601_vm12, %v834_v51, 0  ;;  %v812_v60 = vsel %vm1562_vm11, %v810_v56, 0  ;;  %vm2053_vm11 = vcmask 97280  }
 0x65f   : > { %vm2055_vm12 = vmmov %vm2053_vm11 }
 0x660   : > { %v820_v46 = vpop.permute.xlu0 %819  ;;  %v1813_v47 = vpop.permute.xlu1 %825 }
 0x661   : > { %886 = vrot.lane.b32.xlu1 %v1813_v47, %s1371_s14  ;;  %922 = vrot.lane.b32.xlu0 %v1813_v47, %s1372_s20  ;;  %v822_v17 = vsel %vm2052_vm4, 0, %v820_v46  ;;  %vm2066_vm4 = vcmask 523264  }
 0x662   : > { %v1849_v61 = vsel %vm1594_vm7, %v822_v17, 0  ;;  %vm2054_vm7 = vcmask 105472  }
 0x664   : > { %v1819_v48 = vpop.permute.xlu0 %829  ;;  %v838_v49 = vpop.permute.xlu1 %837 }
 0x665   : > { %928 = vrot.lane.b32.xlu1 %v1819_v48, %s1372_s20  ;;  %905 = vrot.lane.b32.xlu0 %v1813_v47, %s1373_s22  ;;  %v840_v58 = vsel %vm493_vm13, %v838_v49, 0 }
 0x666   : > { %v842_v29 = vsel %vm1618_vm14, %v840_v58, 0 }
 0x668   : > { %v1838_v59 = vpop.permute.xlu1 %827  ;;  %v850_v13 = vpop.permute.xlu0 %849 }
 0x669   : > { %882 = vrot.lane.b32.xlu1 %v836_v10, %s1371_s14  ;;  %901 = vrot.lane.b32.xlu0 %v1829_v54, %s1373_s22  ;;  %v852_v5 = vsel %vm2054_vm7, %v850_v13, 0 }
 0x66a   : > { %v854_v8 = vsel %vm1676_vm9, %v852_v5, 0 }
 0x66c   : > { %v844_v0 = vpop.permute.xlu1 %843  ;;  %v862_v6 = vpop.permute.xlu0 %861 }
 0x66d   : > { %880 = vrot.lane.b32.xlu0 %v812_v60, %s1371_s14  ;;  %924 = vrot.lane.b32.xlu1 %v842_v29, %s1372_s20  ;;  %v846_v2 = vsel %vm493_vm13, %v844_v0, 0  ;;  %v864_v23 = vsel %vm2055_vm12, %v862_v6, 0  ;;  %vm2056_vm13 = vcmask 89088  }
 0x66e   : > { %v848_v4 = vsel %vm1618_vm14, %v846_v2, 0  ;;  %v866_v9 = vsel %vm1663_vm5, %v864_v23, 0  ;;  %vm2057_vm14 = vcmask 392192  }
 0x670   : > { %v856_v63 = vpop.permute.xlu1 %855  ;;  %v796_v12 = vpop.permute.xlu0 %795 }
 0x671   : > { %907 = vrot.lane.b32.xlu1 %v1849_v61, %s1373_s22  ;;  %926 = vrot.lane.b32.xlu0 %v1838_v59, %s1372_s20  ;;  %v858_v1 = vsel %vm2053_vm11, %v856_v63, 0  ;;  %v798_v21 = vsel %vm408_vm8, 0, %v796_v12 }
 0x672   : > { %v860_v25 = vsel %vm1663_vm5, %v858_v1, 0  ;;  %v800_v52 = vsel %vm1711_vm3, %v798_v21, 0  ;;  %vm2058_vm3 = vmmov %vm2057_vm14 }
 0x673   : > { %vm2059_vm5 = vmmov %vm2058_vm3 }
 0x674   : > { %v868_v14 = vpop.permute.xlu1 %867  ;;  %v885_v57 = vpop.permute.xlu0 %884  ;;  %vm2060_vm8 = vmmov %vm2058_vm3 }
 0x675   : > { %911 = vrot.lane.b32.xlu1 %v1819_v48, %s1373_s22  ;;  %909 = vrot.lane.b32.xlu0 %v1838_v59, %s1373_s22  ;;  %v870_v55 = vsel %vm2056_vm13, %v868_v14, 0  ;;  %v949_v41 = vsel %vm363_vm1, %v1829_v54, %v885_v57  ;;  %vm2061_vm9 = vmmov %vm2058_vm3 }
 0x676   : > { %v872_v11 = vsel %vm1691_vm15, %v870_v55, 0  ;;  %vm2062_vm15 = vmmov %vm2058_vm3 }
 0x677   : > { %vm2063_vm6 = vmmov %vm2058_vm3 }
 0x678   : > { %v921_v44 = vpop.permute.xlu1 %920  ;;  %vm2064_vm10 = vmmov %vm2058_vm3 }
 0x679   : > { %890 = vrot.lane.b32.xlu1 %v1838_v59, %s1371_s14  ;;  %892 = vrot.lane.b32.xlu0 %v1819_v48, %s1371_s14  ;;  %vm2065_vm2 = vmmov %vm2058_vm3 }
 0x67c   : > { %v904_v15 = vpop.permute.xlu1 %903 }
 0x67d   : > { %888 = vrot.lane.b32.xlu0 %v842_v29, %s1371_s14  ;;  %932 = vrot.lane.b32.xlu1 %v860_v25, %s1372_s20 }
 0x681   : > { %930 = vrot.lane.b32.xlu0 %v848_v4, %s1372_s20  ;;  %915 = vrot.lane.b32.xlu1 %v860_v25, %s1373_s22 }
 0x685   : > { %913 = vrot.lane.b32.xlu0 %v854_v8, %s1373_s22  ;;  %894 = vrot.lane.b32.xlu1 %v848_v4, %s1371_s14  ;;  %v1292_v8 = vld [vmem:[%s1998_s3] ss:$8 sps:$4 sm:$0xff]  }
 0x689   : > { %934 = vrot.lane.b32.xlu0 %v866_v9, %s1372_s20  ;;  %936 = vrot.lane.b32.xlu1 %v872_v11, %s1372_s20 }
 0x68d   : > { %917 = vrot.lane.b32.xlu0 %v866_v9, %s1373_s22  ;;  %s188_s22 = sand.u32 1, %s1361_s16  }
 0x68e   : > { %s1179_s5 = sshll.u32 %s188_s22, 4  ;;  %s1954_s19 = scalar_lea.sflag [#allocation3], %s188_s22 }
 0x68f   : > { %s190_s7 = scalar_lea.vmem [#allocation2], %s1179_s5 }
 0x690   : > { %s1113_s8 = sshll.u32 %s190_s7, 4  ;;  %s1951_s8 = int_to_ptr.vmem [resolvable:$true] %s1113_s8 }
 0x691   : > { %s1307_s9 = scalar_lea.vmem %s1951_s8, 256  ;;  %p1314_p0 = scmp.lt.s32.totalorder %s1951_s8, %s1312_s23 }
 0x692   : > { %p1308_p11 = scmp.ne.s32.totalorder %s1951_s8, %s1307_s9  ;;  %p1315_p1 = scmp.lt.s32.totalorder %s1313_s27, %s1307_s9 }
 0x694   : > { %p1309_p12 = pnand %p1308_p11, %p1456_p5  ;;  %p1316_p2 = por %p1315_p1, %p1314_p0 }
 0x696   : > { %p1310_p13 = pneg %p1309_p12 }
 0x698   : > { %p1317_p3 = pnand %p1316_p2, %p1310_p13 }
 0x6cd   : > { %v879_v16 = vpop.permute.xlu1 %878 }
 0x6ce   : > { %v940_v24 = vsel %vm363_vm1, %v800_v52, %v879_v16 }
 0x6d3   : > { %v923_v18 = vpop.permute.xlu0 %922  ;;  %v887_v19 = vpop.permute.xlu1 %886 }
 0x6d4   : > { %v952_v53 = vsel %vm363_vm1, %v1768_v40, %v887_v19 }
 0x6d7   : > { %v906_v36 = vpop.permute.xlu0 %905  ;;  %v929_v22 = vpop.permute.xlu1 %928 }
 0x6db   : > { %v902_v27 = vpop.permute.xlu0 %901  ;;  %v883_v28 = vpop.permute.xlu1 %882 }
 0x6dc   : > { %v966_v30 = vsel %vm261_vm0, %v940_v24, %v902_v27  ;;  %v946_v7 = vsel %vm363_vm1, %v812_v60, %v883_v28 }
 0x6dd   : > { %v984_v31 = vsel %vm2057_vm14, %v966_v30, %v921_v44  ;;  %v970_v39 = vsel %vm261_vm0, %v946_v7, %v906_v36 }
 0x6de   : > { %1025 = vmatpush1.bf16.msra.mxu0 %v984_v31 }
 0x6df   : > { %v881_v32 = vpop.permute.xlu0 %880  ;;  %v925_v33 = vpop.permute.xlu1 %924  ;;  %1026 = vmatprep.subr.bf16.mxu0 %v1374_v38 }
 0x6e0   : > { %v943_v3 = vsel %vm363_vm1, %v1809_v43, %v881_v32  ;;  %v990_v20 = vsel %vm2059_vm5, %v970_v39, %v925_v33 }
 0x6e1   : > { %v968_v34 = vsel %vm261_vm0, %v943_v3, %v904_v15 }
 0x6e2   : > { %v987_v35 = vsel %vm2058_vm3, %v968_v34, %v923_v18 }
 0x6e3   : > { %v927_v26 = vpop.permute.xlu0 %926  ;;  %1027 = vmatpush1.bf16.msra.mxu0 %v987_v35  ;;  %v908_v37 = vpop.permute.xlu1 %907 }
 0x6e4   : > { %1028 = vmatprep.subr.bf16.mxu0 %v1374_v38  ;;  %v972_v42 = vsel %vm261_vm0, %v949_v41, %v908_v37 }
 0x6e5   : > { %v993_v46 = vsel %vm2060_vm8, %v972_v42, %v927_v26 }
 0x6e7   : > { %v910_v43 = vpop.permute.xlu0 %909  ;;  %1029 = vmatpush1.bf16.msra.mxu0 %v990_v20  ;;  %v912_v45 = vpop.permute.xlu1 %911 }
 0x6e8   : > { %1030 = vmatprep.subr.bf16.mxu0 %v1374_v38  ;;  %v974_v49 = vsel %vm261_vm0, %v952_v53, %v910_v43 }
 0x6e9   : > { %v996_v54 = vsel %vm2061_vm9, %v974_v49, %v929_v22 }
 0x6eb   : > { %v893_v50 = vpop.permute.xlu0 %892  ;;  %1031 = vmatpush1.bf16.msra.mxu0 %v993_v46  ;;  %v891_v51 = vpop.permute.xlu1 %890 }
 0x6ec   : > { %1032 = vmatprep.subr.bf16.mxu0 %v1374_v38  ;;  %v958_v0 = vsel %vm363_vm1, %v1849_v61, %v891_v51 }
 0x6ef   : > { %v889_v10 = vpop.permute.xlu0 %888  ;;  %1033 = vmatpush1.bf16.msra.mxu0 %v996_v54  ;;  %v933_v56 = vpop.permute.xlu1 %932 }
 0x6f0   : > { %v955_v58 = vsel %vm363_vm1, %v1813_v47, %v889_v10  ;;  %1034 = vmatprep.subr.bf16.mxu0 %v1374_v38  ;;  %v961_v47 = vsel %vm363_vm1, %v1838_v59, %v893_v50 }
 0x6f1   : > { %v976_v60 = vsel %vm261_vm0, %v955_v58, %v912_v45 }
 0x6f3   : > { %v931_v40 = vpop.permute.xlu0 %930  ;;  %v916_v17 = vpop.permute.xlu1 %915 }
 0x6f4   : > { %v999_v29 = vsel %vm2062_vm15, %v976_v60, %v931_v40  ;;  %v980_v2 = vsel %vm261_vm0, %v961_v47, %v916_v17 }
 0x6f5   : > { %1035 = vmatpush1.bf16.msra.mxu0 %v999_v29 }
 0x6f6   : > { %1036 = vmatprep.subr.bf16.mxu0 %v1374_v38 }
 0x6f7   : > { %v914_v63 = vpop.permute.xlu0 %913  ;;  %v895_v25 = vpop.permute.xlu1 %894 }
 0x6f8   : > { %v978_v1 = vsel %vm261_vm0, %v958_v0, %v914_v63  ;;  %v964_v61 = vsel %vm363_vm1, %v1819_v48, %v895_v25  ;;  %vm2067_vm1 = vmmov %vm2066_vm4 }
 0x6f9   : > { %v1002_v13 = vsel %vm2063_vm6, %v978_v1, %v933_v56 }
 0x6fa   : > { %1037 = vmatpush1.bf16.msra.mxu0 %v1002_v13 }
 0x6fb   : > { %v935_v4 = vpop.permute.xlu0 %934  ;;  %1038 = vmatprep.subr.bf16.mxu0 %v1374_v38  ;;  %v937_v14 = vpop.permute.xlu1 %936 }
 0x6fc   : > { %v1005_v5 = vsel %vm2064_vm10, %v980_v2, %v935_v4 }
 0x6fe   : > { %1039 = vmatpush1.bf16.msra.mxu0 %v1005_v5 }
 0x6ff   : > { %v918_v6 = vpop.permute.xlu0 %917  ;;  %1040 = vmatprep.subr.bf16.mxu0 %v1374_v38 }
 0x700   : > { %v982_v62 = vsel %vm261_vm0, %v964_v61, %v918_v6  ;;  %vm2068_vm0 = vmmov %vm2067_vm1 }
 0x701   : > { %v1008_v59 = vsel %vm2065_vm2, %v982_v62, %v937_v14  ;;  %vm2069_vm11 = vmmov %vm2068_vm0 }
 0x702   : > { %1041 = vmatpush1.bf16.msra.mxu0 %v1008_v59  ;;  %vm2070_vm12 = vmmov %vm2068_vm0 }
 0x703   : > { %vm2071_vm14 = vmmov %vm2068_vm0 }
 0x705   : > { %1057 = vmatmul.mubr.bf16.vlgmr.msra.gmra.mrb[8].mxu0 %v1292_v8 }
 0x7d8   : > { %v1058_v23 = vpop.f32.mrb[8].mxu0 }
 0x7d9   : > { %v1060_v55 = vpop.f32.mrb[9].mxu0  ;;  %v1065_v9 = vsel %vm2066_vm4, %v1058_v23, 0.0 }
 0x7da   : > { %1066 = vadd.xlane.f32.xlu0 %v1065_v9  ;;  %v1061_v48 = vpop.f32.mrb[10].mxu0 }
 0x7db   : > { %v1063_v11 = vpop.f32.mrb[11].mxu0  ;;  %v1068_v38 = vsel %vm2067_vm1, %v1061_v48, 0.0 }
 0x7dc   : > { %1069 = vadd.xlane.f32.xlu1 %v1068_v38 }
 0x867   : > { %v1067_v44 = vpop.xlane.xlu0 %1066 }
 0x868   : > { %v1071_v12 = vmul.f32 0.015625, %v1067_v44 }
 0x869   : > { %v1070_v15 = vpop.xlane.xlu1 %1069 }
 0x86a   : > { %v1073_v57 = vsub.f32 %v1058_v23, %v1071_v12  ;;  %v1072_v16 = vmul.f32 0.015625, %v1070_v15 }
 0x86c   : > { %v1074_v18 = vsub.f32 %v1061_v48, %v1072_v16  ;;  %v1075_v19 = vmul.f32 %v1073_v57, %v1073_v57 }
 0x86e   : > { %v1077_v21 = vsel %vm2068_vm0, %v1075_v19, 0.0  ;;  %v1076_v36 = vmul.f32 %v1074_v18, %v1074_v18 }
 0x86f   : > { %1078 = vadd.xlane.f32.xlu0 %v1077_v21 }
 0x870   : > { %v1080_v22 = vsel %vm2069_vm11, %v1076_v36, 0.0 }
 0x873   : > { %1081 = vadd.xlane.f32.xlu0 %v1080_v22 }
 0x8fc   : > { %v1079_v52 = vpop.xlane.xlu0 %1078 }
 0x8fd   : > { %v1083_v24 = vmul.f32 0.015625, %v1079_v52 }
 0x8ff   : > { %v1085_v27 = vadd.f32 1e-05, %v1083_v24 }
 0x900   : > { %v1082_v28 = vpop.xlane.xlu0 %1081 }
 0x901   : > { %1303 = vrsqrt.f32 %v1085_v27  ;;  %v1084_v30 = vmul.f32 0.015625, %v1082_v28 }
 0x903   : > { %v1086_v31 = vadd.f32 1e-05, %v1084_v30 }
 0x905   : > { %1305 = vrsqrt.f32 %v1086_v31 }
 0x90b   : > { %v1304_v32 = vpop.eup %1303 }
 0x90c   : > { %v1089_v33 = vmul.f32 %v1304_v32, %v1073_v57 }
 0x90e   : > { %v1093_v3 = vmul.f32 0.2, %v1089_v33  ;;  %vm1091_vm7 = vcmp.ge.f32.partialorder %v1089_v33, 0.0 }
 0x90f   : > { %v1306_v34 = vpop.eup %1305 }
 0x910   : > { %v1090_v7 = vmul.f32 %v1306_v34, %v1074_v18  ;;  %v1095_v35 = vsel %vm1091_vm7, %v1089_v33, %v1093_v3 }
 0x911   : > { %1097 = vst.msk [vmem:[%s190_s7] sm:$0xff] %vm2070_vm12, %v1095_v35 }
 0x912   : > { %v1094_v26 = vmul.f32 0.2, %v1090_v7  ;;  %vm1092_vm13 = vcmp.ge.f32.partialorder %v1090_v7, 0.0 }
 0x914   : > { %v1096_v37 = vsel %vm1092_vm13, %v1090_v7, %v1094_v26 }
 0x915   : > { %1098 = vst.msk [vmem:[%s190_s7 + $0x8] sm:$0xff] %vm2071_vm14, %v1096_v37 }
 0x916   : > { %1320 = shalt.err (!%p1317_p3)
}
 0x917   : > { %s1321_s28 = scalar_lea.hbm %s1949_s12, 256  ;;  %s1325_s14 = scalar_lea.hbm %s1999_s4, 512 }
 0x918   : > { %p1322_p4 = scmp.ne.s32.totalorder %s1949_s12, %s1321_s28  ;;  %p1326_p9 = scmp.lt.u32.totalorder %s1949_s12, %s1999_s4 }
 0x919   : > { %p1327_p10 = scmp.lt.u32.totalorder %s1325_s14, %s1321_s28  ;;  %p1329_p12 = scmp.lt.u32.totalorder %s1321_s28, %s1949_s12 }
 0x91a   : > { %p1323_p7 = pnand %p1322_p4, %p1456_p5 }
 0x91b   : > { %p1328_p11 = por %p1327_p10, %p1326_p9 }
 0x91c   : > { %p1324_p8 = pneg %p1323_p7 }
 0x91d   : > { %p1330_p13 = por %p1329_p12, %p1328_p11 }
 0x91f   : > { %p1331_p0 = pnand %p1330_p13, %p1324_p8 }
 0x921   : > { %1334 = shalt.err (!%p1331_p0)
}
 0x922   : > { %s1391_s5 = smov 128   ;;  %s1392_s6 = smov 8  }
 0x923   : > { %1223 = dma.vmem_to_hbm [thread:$0]  (%p1456_p5), %s1951_s8, 256, %s1949_s12, %s1954_s19, %s1391_s5, %s1391_s5, %s1392_s6  }
 0x924 PF: > { %p1229_p1 = scmp.ge.s32.totalorder %s1369_s18, 2  ;;  %s1128_s7 = sand.u32 1, %s1357_s15  }
 0x925   : > { %s1129_s10 = scalar_lea.sflag [#allocation3], %s1128_s7 }
 0x926   : > { %p1226_p2 = pnand %p1229_p1, %p1460_p6 }
 0x928   : > { %1352 = dma.done.wait (!%p1226_p2), %s1129_s10, 256  }
 0x929   : > { %1354 = vsyncadd (!%p1226_p2), %s1129_s10, 4294967040  ;;  %p14_p3 = scmp.ge.s32.totalorder %s1443_s21, 4   ;;  %s2072_s15 = smov %s1361_s16 }
 0x92a   : > { %s2073_s16 = smov %s1365_s17  ;;  %s2074_s17 = smov %s1454_s24 }
 0x92b   : > { %s2075_s18 = smov %s1443_s21  ;;  %16 = sbr.rel (!%p14_p3) target bundleno = 3 (0x3), region = 71 }
 0x932   :  { %1134 = vsyncpa [#allocation3], 1 }
 0x933   :  { %1136 = vsyncpa [#allocation3 + $0x1], 1 }

</bundles_post_ra>
